<compile_context>
chip_gen: v7x
topology: tpu7x:2x2x1
jax: 0.10.0
libtpu: 0.0.40
codegen_flags: <defaults>
</compile_context>

<pallas_src>
import math
from functools import partial

import jax
import jax.numpy as jnp
from jax.experimental import pallas as pl
from jax.experimental.pallas import tpu as pltpu


# ---------------------------------------------------------------------------
# Fused kernel: encoder layer (nhead=1, post-LN, eval) on TB sequences per step,
# running batch-mean accumulation, and the Linear head on the final step.
# ---------------------------------------------------------------------------
def _fused_encoder_pool_fc_kernel(
        x_ref, wqkv_ref, bqkv_ref, wo_ref, bo_ref,
        g1_ref, b1n_ref, w1_ref, b1_ref, w2_ref, b2_ref,
        g2_ref, b2n_ref, wfc_ref, bfc_ref,
        o_ref, acc_ref, *, inv_batch):
    step = pl.program_id(0)
    eps = 1e-5

    @pl.when(step == 0)
    def _():
        acc_ref[...] = jnp.zeros_like(acc_ref)

    x = x_ref[...]                                   # (TB, S, D) f32
    TB, S, D = x.shape
    xf = x.reshape(TB * S, D)                        # flattened token-wise view

    # ----- fused QKV projection: bf16 MXU operands, f32 accumulation -----
    # (1/sqrt(D) attention scale is pre-folded into the Q block of wqkv/bqkv)
    qkv = jnp.dot(xf.astype(jnp.bfloat16), wqkv_ref[...],
                  preferred_element_type=jnp.float32) + bqkv_ref[...]
    q = qkv[:, 0 * D:1 * D].reshape(TB, S, D)
    k = qkv[:, 1 * D:2 * D].reshape(TB, S, D)
    v = qkv[:, 2 * D:3 * D].reshape(TB, S, D)

    # ----- per-sequence attention (contract the feature dim; no k transpose) -----
    scores = jax.lax.dot_general(
        q, k, (((2,), (2,)), ((0,), (0,))),
        preferred_element_type=jnp.float32)          # (TB, S, S)
    scores = scores - jnp.max(scores, axis=-1, keepdims=True)
    p = jnp.exp(scores)
    p = p * pl.reciprocal(jnp.sum(p, axis=-1, keepdims=True), approx=True)

    attn = jax.lax.dot_general(
        p.astype(jnp.bfloat16), v.astype(jnp.bfloat16),
        (((2,), (1,)), ((0,), (0,))),
        preferred_element_type=jnp.float32)          # (TB, S, D)
    attnf = jnp.dot(attn.reshape(TB * S, D).astype(jnp.bfloat16), wo_ref[...],
                    preferred_element_type=jnp.float32) + bo_ref[...]

    # ----- residual + LayerNorm1 (f32 VPU math; dropout identity in eval) -----
    h = xf + attnf
    mu = jnp.mean(h, axis=-1, keepdims=True)
    var = jnp.mean(jnp.square(h - mu), axis=-1, keepdims=True)
    h = (h - mu) * jax.lax.rsqrt(var + eps) * g1_ref[...] + b1n_ref[...]

    # ----- feed-forward: bf16 MXU operands, f32 accumulation -----
    f = jnp.dot(h.astype(jnp.bfloat16), w1_ref[...],
                preferred_element_type=jnp.float32) + b1_ref[...]
    f = jnp.maximum(f, 0.0)                          # ReLU (f32)
    f = jnp.dot(f.astype(jnp.bfloat16), w2_ref[...],
                preferred_element_type=jnp.float32) + b2_ref[...]

    # ----- residual + LayerNorm2 -----
    y = h + f
    mu2 = jnp.mean(y, axis=-1, keepdims=True)
    var2 = jnp.mean(jnp.square(y - mu2), axis=-1, keepdims=True)
    y = (y - mu2) * jax.lax.rsqrt(var2 + eps) * g2_ref[...] + b2n_ref[...]

    # ----- running sum over the batch axis (literal x.mean(dim=0) after permute-back) -----
    acc_ref[...] += jnp.sum(y.reshape(TB, S, D), axis=0)

    # ----- finalize: divide by B and apply the Linear head (tiny (S,D)@(D,C)) -----
    @pl.when(step == pl.num_programs(0) - 1)
    def _():
        pooled = acc_ref[...] * inv_batch            # (S, D)
        o_ref[...] = (jnp.dot(pooled, wfc_ref[...],
                              preferred_element_type=jnp.float32)
                      + bfc_ref[...]).astype(o_ref.dtype)


# ---------------------------------------------------------------------------
# One-time weight re-layout: PyTorch (out, in) -> math (in, out), bf16 for the
# MXU-heavy weights, attention scale folded into the Q projection.
# Call once at init; NOT per forward.
# ---------------------------------------------------------------------------
def prepack_params(params):
    D = params["out_proj_w"].shape[0]
    FF = params["linear1_w"].shape[0]
    C = params["fc_w"].shape[0]
    scale = 1.0 / math.sqrt(D)

    in_w = params["in_proj_w"]                       # (3D, D)
    in_b = params["in_proj_b"]                       # (3D,)
    wqkv = jnp.concatenate([in_w[:D] * scale, in_w[D:]], axis=0).T  # (D, 3D)
    bqkv = jnp.concatenate([in_b[:D] * scale, in_b[D:]]).reshape(1, 3 * D)

    return dict(
        wqkv=wqkv.astype(jnp.bfloat16),
        bqkv=bqkv.astype(jnp.float32),
        wo=params["out_proj_w"].T.astype(jnp.bfloat16),          # (D, D)
        bo=params["out_proj_b"].reshape(1, D).astype(jnp.float32),
        g1=params["norm1_w"].reshape(1, D).astype(jnp.float32),
        b1n=params["norm1_b"].reshape(1, D).astype(jnp.float32),
        w1=params["linear1_w"].T.astype(jnp.bfloat16),           # (D, FF)
        b1=params["linear1_b"].reshape(1, FF).astype(jnp.float32),
        w2=params["linear2_w"].T.astype(jnp.bfloat16),           # (FF, D)
        b2=params["linear2_b"].reshape(1, D).astype(jnp.float32),
        g2=params["norm2_w"].reshape(1, D).astype(jnp.float32),
        b2n=params["norm2_b"].reshape(1, D).astype(jnp.float32),
        wfc=params["fc_w"].T.astype(jnp.float32),                # (D, C) tiny, keep f32
        bfc=params["fc_b"].reshape(1, C).astype(jnp.float32),
    )


# ---------------------------------------------------------------------------
# Wrapper: single fused pallas_call over the batch axis.
# ---------------------------------------------------------------------------
def transformer_model_forward(x, packed):
    """x: (B, S, D) float32. packed: output of prepack_params()."""
    B, S, D = x.shape
    FF = packed["w1"].shape[1]
    C = packed["wfc"].shape[1]

    # TB sequences per grid step so TB*S rows fill the MXU (~256 rows on v6e/v7x).
    tb = max(1, min(B, max(1, 256 // S)))
    while B % tb != 0:
        tb -= 1
    nsteps = B // tb

    def const(shape):
        return pl.BlockSpec(shape, lambda b: (0,) * len(shape))  # resident weights

    kernel = partial(_fused_encoder_pool_fc_kernel, inv_batch=1.0 / B)

    return pl.pallas_call(
        kernel,
        out_shape=jax.ShapeDtypeStruct((S, C), jnp.float32),
        grid=(nsteps,),
        in_specs=[
            pl.BlockSpec((tb, S, D), lambda b: (b, 0, 0)),  # x (TB sequences / step)
            const((D, 3 * D)),                              # wqkv (bf16)
            const((1, 3 * D)),                              # bqkv
            const((D, D)),                                  # wo (bf16)
            const((1, D)),                                  # bo
            const((1, D)),                                  # norm1 gamma
            const((1, D)),                                  # norm1 beta
            const((D, FF)),                                 # w1 (bf16)
            const((1, FF)),                                 # b1
            const((FF, D)),                                 # w2 (bf16)
            const((1, D)),                                  # b2
            const((1, D)),                                  # norm2 gamma
            const((1, D)),                                  # norm2 beta
            const((D, C)),                                  # fc weight
            const((1, C)),                                  # fc bias
        ],
        out_specs=pl.BlockSpec((S, C), lambda b: (0, 0)),   # accumulator-style output
        scratch_shapes=[pltpu.VMEM((S, D), jnp.float32)],   # running batch-sum of y
        compiler_params=pltpu.CompilerParams(
            dimension_semantics=("arbitrary",)),             # grid carries the pool acc
    )(x, packed["wqkv"], packed["bqkv"], packed["wo"], packed["bo"],
      packed["g1"], packed["b1n"], packed["w1"], packed["b1"],
      packed["w2"], packed["b2"], packed["g2"], packed["b2n"],
      packed["wfc"], packed["bfc"])


# ---------------------------------------------------------------------------
# Pure-JAX reference mirroring the PyTorch forward (eval mode, f32)
# ---------------------------------------------------------------------------
def reference(x, params, eps=1e-5):
    B, S, D = x.shape
    wq, wk, wv = jnp.split(params["in_proj_w"], 3, axis=0)
    bq, bk, bv = jnp.split(params["in_proj_b"], 3)
    q = x @ wq.T + bq
    k = x @ wk.T + bk
    v = x @ wv.T + bv
    scores = jnp.einsum("bsd,btd->bst", q, k) / math.sqrt(D)
    p = jax.nn.softmax(scores, axis=-1)
    attn = jnp.einsum("bst,btd->bsd", p, v)
    attn = attn @ params["out_proj_w"].T + params["out_proj_b"]

    def layer_norm(t, g, b):
        mu = t.mean(-1, keepdims=True)
        var = ((t - mu) ** 2).mean(-1, keepdims=True)
        return (t - mu) / jnp.sqrt(var + eps) * g + b

    h = layer_norm(x + attn, params["norm1_w"], params["norm1_b"])
    f = (jax.nn.relu(h @ params["linear1_w"].T + params["linear1_b"])
         @ params["linear2_w"].T + params["linear2_b"])
    y = layer_norm(h + f, params["norm2_w"], params["norm2_b"])
    pooled = y.mean(axis=0)                    # literal x.mean(dim=0) after permute-back
    return pooled @ params["fc_w"].T + params["fc_b"]


if __name__ == "__main__":
    B, S, D = 2, 8, 128        # batch, seq, d_model (lane-dense d_model)
    FF = 2048                  # nn.TransformerEncoderLayer default dim_feedforward
    C = 8                      # num_classes

    key = jax.random.PRNGKey(0)
    ks = jax.random.split(key, 16)

    def w(k, shape, fan_in):
        return jax.random.normal(k, shape, jnp.float32) / math.sqrt(fan_in)

    params = dict(
        in_proj_w=w(ks[0], (3 * D, D), D),
        in_proj_b=0.01 * jax.random.normal(ks[1], (3 * D,), jnp.float32),
        out_proj_w=w(ks[2], (D, D), D),
        out_proj_b=0.01 * jax.random.normal(ks[3], (D,), jnp.float32),
        norm1_w=1.0 + 0.05 * jax.random.normal(ks[4], (D,), jnp.float32),
        norm1_b=0.05 * jax.random.normal(ks[5], (D,), jnp.float32),
        linear1_w=w(ks[6], (FF, D), D),
        linear1_b=0.01 * jax.random.normal(ks[7], (FF,), jnp.float32),
        linear2_w=w(ks[8], (D, FF), FF),
        linear2_b=0.01 * jax.random.normal(ks[9], (D,), jnp.float32),
        norm2_w=1.0 + 0.05 * jax.random.normal(ks[10], (D,), jnp.float32),
        norm2_b=0.05 * jax.random.normal(ks[11], (D,), jnp.float32),
        fc_w=w(ks[12], (C, D), D),
        fc_b=0.01 * jax.random.normal(ks[13], (C,), jnp.float32),
    )
    x = jax.random.normal(ks[14], (B, S, D), jnp.float32)

    packed = prepack_params(params)                 # one-time re-layout (hoisted out of forward)
    fwd = jax.jit(transformer_model_forward)
    out = jax.block_until_ready(fwd(x, packed))

    ref = reference(x, params)
    assert out.shape == (S, C), out.shape
    err = float(jnp.max(jnp.abs(out - ref)))
    # tolerance accounts for bf16 MXU operands on the attention + FFN paths
    # (intentional accuracy/throughput trade-off vs the f32 reference)
    assert err < 7e-2, f"max abs err {err}"
    print("KERNEL_OK")
</pallas_src>

<mosaic_0001>
module attributes {stable_mosaic.version = 11 : i64} {
  func.func @_fused_encoder_pool_fc_kernel(%arg0: i32, %arg1: memref<2x8x128xf32, #tpu.memory_space<vmem>>, %arg2: memref<128x384xbf16, #tpu.memory_space<vmem>>, %arg3: memref<1x384xf32, #tpu.memory_space<vmem>>, %arg4: memref<128x128xbf16, #tpu.memory_space<vmem>>, %arg5: memref<1x128xf32, #tpu.memory_space<vmem>>, %arg6: memref<1x128xf32, #tpu.memory_space<vmem>>, %arg7: memref<1x128xf32, #tpu.memory_space<vmem>>, %arg8: memref<128x2048xbf16, #tpu.memory_space<vmem>>, %arg9: memref<1x2048xf32, #tpu.memory_space<vmem>>, %arg10: memref<2048x128xbf16, #tpu.memory_space<vmem>>, %arg11: memref<1x128xf32, #tpu.memory_space<vmem>>, %arg12: memref<1x128xf32, #tpu.memory_space<vmem>>, %arg13: memref<1x128xf32, #tpu.memory_space<vmem>>, %arg14: memref<128x8xf32, #tpu.memory_space<vmem>>, %arg15: memref<1x8xf32, #tpu.memory_space<vmem>>, %arg16: memref<8x8xf32, #tpu.memory_space<vmem>>, %arg17: memref<8x128xf32, #tpu.memory_space<vmem>>) attributes {dimension_semantics = [#tpu.dimension_semantics<arbitrary>], iteration_bounds = array<i64: 1>, scalar_prefetch = 0 : i64, scratch_operands = 1 : i64, tpu.core_type = #tpu.core_type<tc>, window_params = [{transform_indices = @transform_0, window_bounds = array<i64: 2, 8, 128>}, {pipeline_mode = #tpu.pipeline_mode<synchronous>, transform_indices = @transform_1, window_bounds = array<i64: 128, 384>}, {pipeline_mode = #tpu.pipeline_mode<synchronous>, transform_indices = @transform_2, window_bounds = array<i64: 1, 384>}, {pipeline_mode = #tpu.pipeline_mode<synchronous>, transform_indices = @transform_3, window_bounds = array<i64: 128, 128>}, {pipeline_mode = #tpu.pipeline_mode<synchronous>, transform_indices = @transform_4, window_bounds = array<i64: 1, 128>}, {pipeline_mode = #tpu.pipeline_mode<synchronous>, transform_indices = @transform_5, window_bounds = array<i64: 1, 128>}, {pipeline_mode = #tpu.pipeline_mode<synchronous>, transform_indices = @transform_6, window_bounds = array<i64: 1, 128>}, {pipeline_mode = #tpu.pipeline_mode<synchronous>, transform_indices = @transform_7, window_bounds = array<i64: 128, 2048>}, {pipeline_mode = #tpu.pipeline_mode<synchronous>, transform_indices = @transform_8, window_bounds = array<i64: 1, 2048>}, {pipeline_mode = #tpu.pipeline_mode<synchronous>, transform_indices = @transform_9, window_bounds = array<i64: 2048, 128>}, {pipeline_mode = #tpu.pipeline_mode<synchronous>, transform_indices = @transform_10, window_bounds = array<i64: 1, 128>}, {pipeline_mode = #tpu.pipeline_mode<synchronous>, transform_indices = @transform_11, window_bounds = array<i64: 1, 128>}, {pipeline_mode = #tpu.pipeline_mode<synchronous>, transform_indices = @transform_12, window_bounds = array<i64: 1, 128>}, {pipeline_mode = #tpu.pipeline_mode<synchronous>, transform_indices = @transform_13, window_bounds = array<i64: 128, 8>}, {pipeline_mode = #tpu.pipeline_mode<synchronous>, transform_indices = @transform_14, window_bounds = array<i64: 1, 8>}, {pipeline_mode = #tpu.pipeline_mode<synchronous>, transform_indices = @transform_15, window_bounds = array<i64: 8, 8>}]} {
    %c0_i32 = arith.constant 0 : i32
    %0 = arith.cmpi eq, %arg0, %c0_i32 : i32
    %1 = arith.extui %0 : i1 to i32
    %c0_i32_0 = arith.constant 0 : i32
    %2 = arith.cmpi ne, %1, %c0_i32_0 : i32
    scf.if %2 {
      %cst_52 = arith.constant 0.000000e+00 : f32
      %110 = vector.broadcast %cst_52 : f32 to vector<8x128xf32>
      %c0_53 = arith.constant 0 : index
      %c0_54 = arith.constant 0 : index
      %111 = vector.load %arg17[%c0_53, %c0_54] : memref<8x128xf32, #tpu.memory_space<vmem>>, vector<8x128xf32>
      tpu.vector_store %arg17[%c0_53, %c0_54], %110 {strides = array<i32>} : memref<8x128xf32, #tpu.memory_space<vmem>>, vector<8x128xf32>,
    } else {
    }
    %c0 = arith.constant 0 : index
    %c0_1 = arith.constant 0 : index
    %c0_2 = arith.constant 0 : index
    %3 = vector.load %arg1[%c0, %c0_1, %c0_2] : memref<2x8x128xf32, #tpu.memory_space<vmem>>, vector<2x8x128xf32>
    %4 = vector.shape_cast %3 : vector<2x8x128xf32> to vector<16x128xf32>
    %5 = arith.truncf %4 : vector<16x128xf32> to vector<16x128xbf16>
    %c0_3 = arith.constant 0 : index
    %c0_4 = arith.constant 0 : index
    %6 = vector.load %arg2[%c0_3, %c0_4] : memref<128x384xbf16, #tpu.memory_space<vmem>>, vector<128x384xbf16>
    %cst = arith.constant dense<0.000000e+00> : vector<16x384xf32>
    %7 = tpu.matmul %5, %6, %cst {dimension_numbers = #tpu.dot_dimension_numbers<[1], [0], [0], [1], [0, 0, 1, 1], [], []>} : vector<16x128xbf16>, vector<128x384xbf16>, vector<16x384xf32> -> vector<16x384xf32>
    %c0_5 = arith.constant 0 : index
    %c0_6 = arith.constant 0 : index
    %8 = vector.load %arg3[%c0_5, %c0_6] : memref<1x384xf32, #tpu.memory_space<vmem>>, vector<1x384xf32>
    %9 = vector.broadcast %8 : vector<1x384xf32> to vector<16x384xf32>
    %10 = arith.addf %7, %9 : vector<16x384xf32>
    %11 = vector.extract_strided_slice %10 {offsets = [0, 0], sizes = [16, 128], strides = [1, 1]} : vector<16x384xf32> to vector<16x128xf32>
    %12 = vector.shape_cast %11 : vector<16x128xf32> to vector<2x8x128xf32>
    %13 = vector.extract_strided_slice %10 {offsets = [0, 128], sizes = [16, 128], strides = [1, 1]} : vector<16x384xf32> to vector<16x128xf32>
    %14 = vector.shape_cast %13 : vector<16x128xf32> to vector<2x8x128xf32>
    %15 = vector.extract_strided_slice %10 {offsets = [0, 256], sizes = [16, 128], strides = [1, 1]} : vector<16x384xf32> to vector<16x128xf32>
    %16 = vector.shape_cast %15 : vector<16x128xf32> to vector<2x8x128xf32>
    %cst_7 = arith.constant dense<0.000000e+00> : vector<2x8x8xf32>
    %17 = tpu.matmul %12, %14, %cst_7 {dimension_numbers = #tpu.dot_dimension_numbers<[2], [2], [1], [1], [0, 0, 0, 1, 1, 1], [0], [0]>} : vector<2x8x128xf32>, vector<2x8x128xf32>, vector<2x8x8xf32> -> vector<2x8x8xf32>
    %cst_8 = arith.constant dense<0xFF800000> : vector<2x8xf32>
    %18 = vector.multi_reduction <maximumf>, %17, %cst_8 [2] : vector<2x8x8xf32> to vector<2x8xf32>
    %19 = vector.shape_cast %18 : vector<2x8xf32> to vector<2x8x1xf32>
    %20 = vector.broadcast %19 : vector<2x8x1xf32> to vector<2x8x8xf32>
    %21 = arith.subf %17, %20 : vector<2x8x8xf32>
    %22 = math.exp %21 : vector<2x8x8xf32>
    %cst_9 = arith.constant dense<0.000000e+00> : vector<2x8xf32>
    %23 = vector.multi_reduction <add>, %22, %cst_9 [2] : vector<2x8x8xf32> to vector<2x8xf32>
    %24 = vector.shape_cast %23 : vector<2x8xf32> to vector<2x8x1xf32>
    %25 = tpu.reciprocal %24 {approx = true} : vector<2x8x1xf32> -> vector<2x8x1xf32>
    %26 = vector.broadcast %25 : vector<2x8x1xf32> to vector<2x8x8xf32>
    %27 = arith.mulf %22, %26 : vector<2x8x8xf32>
    %28 = arith.truncf %27 : vector<2x8x8xf32> to vector<2x8x8xbf16>
    %29 = arith.truncf %16 : vector<2x8x128xf32> to vector<2x8x128xbf16>
    %cst_10 = arith.constant dense<0.000000e+00> : vector<2x8x128xf32>
    %30 = tpu.matmul %28, %29, %cst_10 {dimension_numbers = #tpu.dot_dimension_numbers<[2], [1], [1], [2], [0, 0, 0, 1, 1, 2], [0], [0]>} : vector<2x8x8xbf16>, vector<2x8x128xbf16>, vector<2x8x128xf32> -> vector<2x8x128xf32>
    %31 = vector.shape_cast %30 : vector<2x8x128xf32> to vector<16x128xf32>
    %32 = arith.truncf %31 : vector<16x128xf32> to vector<16x128xbf16>
    %c0_11 = arith.constant 0 : index
    %c0_12 = arith.constant 0 : index
    %33 = vector.load %arg4[%c0_11, %c0_12] : memref<128x128xbf16, #tpu.memory_space<vmem>>, vector<128x128xbf16>
    %cst_13 = arith.constant dense<0.000000e+00> : vector<16x128xf32>
    %34 = tpu.matmul %32, %33, %cst_13 {dimension_numbers = #tpu.dot_dimension_numbers<[1], [0], [0], [1], [0, 0, 1, 1], [], []>} : vector<16x128xbf16>, vector<128x128xbf16>, vector<16x128xf32> -> vector<16x128xf32>
    %c0_14 = arith.constant 0 : index
    %c0_15 = arith.constant 0 : index
    %35 = vector.load %arg5[%c0_14, %c0_15] : memref<1x128xf32, #tpu.memory_space<vmem>>, vector<1x128xf32>
    %36 = vector.broadcast %35 : vector<1x128xf32> to vector<16x128xf32>
    %37 = arith.addf %34, %36 : vector<16x128xf32>
    %38 = arith.addf %4, %37 : vector<16x128xf32>
    %cst_16 = arith.constant dense<0.000000e+00> : vector<16xf32>
    %39 = vector.multi_reduction <add>, %38, %cst_16 [1] : vector<16x128xf32> to vector<16xf32>
    %40 = vector.shape_cast %39 : vector<16xf32> to vector<16x1xf32>
    %cst_17 = arith.constant 1.280000e+02 : f32
    %41 = vector.broadcast %cst_17 : f32 to vector<16x1xf32>
    %42 = arith.divf %40, %41 : vector<16x1xf32>
    %43 = vector.broadcast %42 : vector<16x1xf32> to vector<16x128xf32>
    %44 = arith.subf %38, %43 : vector<16x128xf32>
    %45 = arith.mulf %44, %44 : vector<16x128xf32>
    %cst_18 = arith.constant dense<0.000000e+00> : vector<16xf32>
    %46 = vector.multi_reduction <add>, %45, %cst_18 [1] : vector<16x128xf32> to vector<16xf32>
    %47 = vector.shape_cast %46 : vector<16xf32> to vector<16x1xf32>
    %cst_19 = arith.constant 1.280000e+02 : f32
    %48 = vector.broadcast %cst_19 : f32 to vector<16x1xf32>
    %49 = arith.divf %47, %48 : vector<16x1xf32>
    %50 = vector.broadcast %42 : vector<16x1xf32> to vector<16x128xf32>
    %51 = arith.subf %38, %50 : vector<16x128xf32>
    %cst_20 = arith.constant 9.99999974E-6 : f32
    %52 = vector.broadcast %cst_20 : f32 to vector<16x1xf32>
    %53 = arith.addf %49, %52 : vector<16x1xf32>
    %54 = math.rsqrt %53 : vector<16x1xf32>
    %55 = vector.broadcast %54 : vector<16x1xf32> to vector<16x128xf32>
    %56 = arith.mulf %51, %55 : vector<16x128xf32>
    %c0_21 = arith.constant 0 : index
    %c0_22 = arith.constant 0 : index
    %57 = vector.load %arg6[%c0_21, %c0_22] : memref<1x128xf32, #tpu.memory_space<vmem>>, vector<1x128xf32>
    %58 = vector.broadcast %57 : vector<1x128xf32> to vector<16x128xf32>
    %59 = arith.mulf %56, %58 : vector<16x128xf32>
    %c0_23 = arith.constant 0 : index
    %c0_24 = arith.constant 0 : index
    %60 = vector.load %arg7[%c0_23, %c0_24] : memref<1x128xf32, #tpu.memory_space<vmem>>, vector<1x128xf32>
    %61 = vector.broadcast %60 : vector<1x128xf32> to vector<16x128xf32>
    %62 = arith.addf %59, %61 : vector<16x128xf32>
    %63 = arith.truncf %62 : vector<16x128xf32> to vector<16x128xbf16>
    %c0_25 = arith.constant 0 : index
    %c0_26 = arith.constant 0 : index
    %64 = vector.load %arg8[%c0_25, %c0_26] : memref<128x2048xbf16, #tpu.memory_space<vmem>>, vector<128x2048xbf16>
    %cst_27 = arith.constant dense<0.000000e+00> : vector<16x2048xf32>
    %65 = tpu.matmul %63, %64, %cst_27 {dimension_numbers = #tpu.dot_dimension_numbers<[1], [0], [0], [1], [0, 0, 1, 1], [], []>} : vector<16x128xbf16>, vector<128x2048xbf16>, vector<16x2048xf32> -> vector<16x2048xf32>
    %c0_28 = arith.constant 0 : index
    %c0_29 = arith.constant 0 : index
    %66 = vector.load %arg9[%c0_28, %c0_29] : memref<1x2048xf32, #tpu.memory_space<vmem>>, vector<1x2048xf32>
    %67 = vector.broadcast %66 : vector<1x2048xf32> to vector<16x2048xf32>
    %68 = arith.addf %65, %67 : vector<16x2048xf32>
    %cst_30 = arith.constant 0.000000e+00 : f32
    %69 = vector.broadcast %cst_30 : f32 to vector<16x2048xf32>
    %70 = arith.maximumf %68, %69 : vector<16x2048xf32>
    %71 = arith.truncf %70 : vector<16x2048xf32> to vector<16x2048xbf16>
    %c0_31 = arith.constant 0 : index
    %c0_32 = arith.constant 0 : index
    %72 = vector.load %arg10[%c0_31, %c0_32] : memref<2048x128xbf16, #tpu.memory_space<vmem>>, vector<2048x128xbf16>
    %cst_33 = arith.constant dense<0.000000e+00> : vector<16x128xf32>
    %73 = tpu.matmul %71, %72, %cst_33 {dimension_numbers = #tpu.dot_dimension_numbers<[1], [0], [0], [1], [0, 0, 1, 1], [], []>} : vector<16x2048xbf16>, vector<2048x128xbf16>, vector<16x128xf32> -> vector<16x128xf32>
    %c0_34 = arith.constant 0 : index
    %c0_35 = arith.constant 0 : index
    %74 = vector.load %arg11[%c0_34, %c0_35] : memref<1x128xf32, #tpu.memory_space<vmem>>, vector<1x128xf32>
    %75 = vector.broadcast %74 : vector<1x128xf32> to vector<16x128xf32>
    %76 = arith.addf %73, %75 : vector<16x128xf32>
    %77 = arith.addf %62, %76 : vector<16x128xf32>
    %cst_36 = arith.constant dense<0.000000e+00> : vector<16xf32>
    %78 = vector.multi_reduction <add>, %77, %cst_36 [1] : vector<16x128xf32> to vector<16xf32>
    %79 = vector.shape_cast %78 : vector<16xf32> to vector<16x1xf32>
    %cst_37 = arith.constant 1.280000e+02 : f32
    %80 = vector.broadcast %cst_37 : f32 to vector<16x1xf32>
    %81 = arith.divf %79, %80 : vector<16x1xf32>
    %82 = vector.broadcast %81 : vector<16x1xf32> to vector<16x128xf32>
    %83 = arith.subf %77, %82 : vector<16x128xf32>
    %84 = arith.mulf %83, %83 : vector<16x128xf32>
    %cst_38 = arith.constant dense<0.000000e+00> : vector<16xf32>
    %85 = vector.multi_reduction <add>, %84, %cst_38 [1] : vector<16x128xf32> to vector<16xf32>
    %86 = vector.shape_cast %85 : vector<16xf32> to vector<16x1xf32>
    %cst_39 = arith.constant 1.280000e+02 : f32
    %87 = vector.broadcast %cst_39 : f32 to vector<16x1xf32>
    %88 = arith.divf %86, %87 : vector<16x1xf32>
    %89 = vector.broadcast %81 : vector<16x1xf32> to vector<16x128xf32>
    %90 = arith.subf %77, %89 : vector<16x128xf32>
    %cst_40 = arith.constant 9.99999974E-6 : f32
    %91 = vector.broadcast %cst_40 : f32 to vector<16x1xf32>
    %92 = arith.addf %88, %91 : vector<16x1xf32>
    %93 = math.rsqrt %92 : vector<16x1xf32>
    %94 = vector.broadcast %93 : vector<16x1xf32> to vector<16x128xf32>
    %95 = arith.mulf %90, %94 : vector<16x128xf32>
    %c0_41 = arith.constant 0 : index
    %c0_42 = arith.constant 0 : index
    %96 = vector.load %arg12[%c0_41, %c0_42] : memref<1x128xf32, #tpu.memory_space<vmem>>, vector<1x128xf32>
    %97 = vector.broadcast %96 : vector<1x128xf32> to vector<16x128xf32>
    %98 = arith.mulf %95, %97 : vector<16x128xf32>
    %c0_43 = arith.constant 0 : index
    %c0_44 = arith.constant 0 : index
    %99 = vector.load %arg13[%c0_43, %c0_44] : memref<1x128xf32, #tpu.memory_space<vmem>>, vector<1x128xf32>
    %100 = vector.broadcast %99 : vector<1x128xf32> to vector<16x128xf32>
    %101 = arith.addf %98, %100 : vector<16x128xf32>
    %c0_45 = arith.constant 0 : index
    %c0_46 = arith.constant 0 : index
    %102 = vector.load %arg17[%c0_45, %c0_46] : memref<8x128xf32, #tpu.memory_space<vmem>>, vector<8x128xf32>
    %103 = vector.shape_cast %101 : vector<16x128xf32> to vector<2x8x128xf32>
    %cst_47 = arith.constant dense<0.000000e+00> : vector<8x128xf32>
    %104 = vector.multi_reduction <add>, %103, %cst_47 [0] : vector<2x8x128xf32> to vector<8x128xf32>
    %105 = arith.addf %102, %104 : vector<8x128xf32>
    %c0_48 = arith.constant 0 : index
    %c0_49 = arith.constant 0 : index
    %106 = vector.load %arg17[%c0_48, %c0_49] : memref<8x128xf32, #tpu.memory_space<vmem>>, vector<8x128xf32>
    tpu.vector_store %arg17[%c0_48, %c0_49], %105 {strides = array<i32>} : memref<8x128xf32, #tpu.memory_space<vmem>>, vector<8x128xf32>,
    %c0_i32_50 = arith.constant 0 : i32
    %107 = arith.cmpi eq, %arg0, %c0_i32_50 : i32
    %108 = arith.extui %107 : i1 to i32
    %c0_i32_51 = arith.constant 0 : i32
    %109 = arith.cmpi ne, %108, %c0_i32_51 : i32
    scf.if %109 {
      %c0_52 = arith.constant 0 : index
      %c0_53 = arith.constant 0 : index
      %110 = vector.load %arg17[%c0_52, %c0_53] : memref<8x128xf32, #tpu.memory_space<vmem>>, vector<8x128xf32>
      %cst_54 = arith.constant 5.000000e-01 : f32
      %111 = vector.broadcast %cst_54 : f32 to vector<8x128xf32>
      %112 = arith.mulf %110, %111 : vector<8x128xf32>
      %c0_55 = arith.constant 0 : index
      %c0_56 = arith.constant 0 : index
      %113 = vector.load %arg14[%c0_55, %c0_56] : memref<128x8xf32, #tpu.memory_space<vmem>>, vector<128x8xf32>
      %cst_57 = arith.constant dense<0.000000e+00> : vector<8x8xf32>
      %114 = tpu.matmul %112, %113, %cst_57 {dimension_numbers = #tpu.dot_dimension_numbers<[1], [0], [0], [1], [0, 0, 1, 1], [], []>} : vector<8x128xf32>, vector<128x8xf32>, vector<8x8xf32> -> vector<8x8xf32>
      %c0_58 = arith.constant 0 : index
      %c0_59 = arith.constant 0 : index
      %115 = vector.load %arg15[%c0_58, %c0_59] : memref<1x8xf32, #tpu.memory_space<vmem>>, vector<1x8xf32>
      %116 = vector.broadcast %115 : vector<1x8xf32> to vector<8x8xf32>
      %117 = arith.addf %114, %116 : vector<8x8xf32>
      %c0_60 = arith.constant 0 : index
      %c0_61 = arith.constant 0 : index
      %118 = vector.load %arg16[%c0_60, %c0_61] : memref<8x8xf32, #tpu.memory_space<vmem>>, vector<8x8xf32>
      tpu.vector_store %arg16[%c0_60, %c0_61], %117 {strides = array<i32>} : memref<8x8xf32, #tpu.memory_space<vmem>>, vector<8x8xf32>,
    } else {
    }
    return
  }
  func.func @transform_0(%arg0: i32) -> (i32, i32, i32) {
    %c0_i32 = arith.constant 0 : i32
    %c0_i32_0 = arith.constant 0 : i32
    %c0_i32_1 = arith.constant 0 : i32
    return %arg0, %c0_i32, %c0_i32_0 : i32, i32, i32
  }
  func.func @transform_1(%arg0: i32) -> (i32, i32) {
    %c0_i32 = arith.constant 0 : i32
    %c0_i32_0 = arith.constant 0 : i32
    %c0_i32_1 = arith.constant 0 : i32
    return %c0_i32, %c0_i32_0 : i32, i32
  }
  func.func @transform_2(%arg0: i32) -> (i32, i32) {
    %c0_i32 = arith.constant 0 : i32
    %c0_i32_0 = arith.constant 0 : i32
    %c0_i32_1 = arith.constant 0 : i32
    return %c0_i32, %c0_i32_0 : i32, i32
  }
  func.func @transform_3(%arg0: i32) -> (i32, i32) {
    %c0_i32 = arith.constant 0 : i32
    %c0_i32_0 = arith.constant 0 : i32
    %c0_i32_1 = arith.constant 0 : i32
    return %c0_i32, %c0_i32_0 : i32, i32
  }
  func.func @transform_4(%arg0: i32) -> (i32, i32) {
    %c0_i32 = arith.constant 0 : i32
    %c0_i32_0 = arith.constant 0 : i32
    %c0_i32_1 = arith.constant 0 : i32
    return %c0_i32, %c0_i32_0 : i32, i32
  }
  func.func @transform_5(%arg0: i32) -> (i32, i32) {
    %c0_i32 = arith.constant 0 : i32
    %c0_i32_0 = arith.constant 0 : i32
    %c0_i32_1 = arith.constant 0 : i32
    return %c0_i32, %c0_i32_0 : i32, i32
  }
  func.func @transform_6(%arg0: i32) -> (i32, i32) {
    %c0_i32 = arith.constant 0 : i32
    %c0_i32_0 = arith.constant 0 : i32
    %c0_i32_1 = arith.constant 0 : i32
    return %c0_i32, %c0_i32_0 : i32, i32
  }
  func.func @transform_7(%arg0: i32) -> (i32, i32) {
    %c0_i32 = arith.constant 0 : i32
    %c0_i32_0 = arith.constant 0 : i32
    %c0_i32_1 = arith.constant 0 : i32
    return %c0_i32, %c0_i32_0 : i32, i32
  }
  func.func @transform_8(%arg0: i32) -> (i32, i32) {
    %c0_i32 = arith.constant 0 : i32
    %c0_i32_0 = arith.constant 0 : i32
    %c0_i32_1 = arith.constant 0 : i32
    return %c0_i32, %c0_i32_0 : i32, i32
  }
  func.func @transform_9(%arg0: i32) -> (i32, i32) {
    %c0_i32 = arith.constant 0 : i32
    %c0_i32_0 = arith.constant 0 : i32
    %c0_i32_1 = arith.constant 0 : i32
    return %c0_i32, %c0_i32_0 : i32, i32
  }
  func.func @transform_10(%arg0: i32) -> (i32, i32) {
    %c0_i32 = arith.constant 0 : i32
    %c0_i32_0 = arith.constant 0 : i32
    %c0_i32_1 = arith.constant 0 : i32
    return %c0_i32, %c0_i32_0 : i32, i32
  }
  func.func @transform_11(%arg0: i32) -> (i32, i32) {
    %c0_i32 = arith.constant 0 : i32
    %c0_i32_0 = arith.constant 0 : i32
    %c0_i32_1 = arith.constant 0 : i32
    return %c0_i32, %c0_i32_0 : i32, i32
  }
  func.func @transform_12(%arg0: i32) -> (i32, i32) {
    %c0_i32 = arith.constant 0 : i32
    %c0_i32_0 = arith.constant 0 : i32
    %c0_i32_1 = arith.constant 0 : i32
    return %c0_i32, %c0_i32_0 : i32, i32
  }
  func.func @transform_13(%arg0: i32) -> (i32, i32) {
    %c0_i32 = arith.constant 0 : i32
    %c0_i32_0 = arith.constant 0 : i32
    %c0_i32_1 = arith.constant 0 : i32
    return %c0_i32, %c0_i32_0 : i32, i32
  }
  func.func @transform_14(%arg0: i32) -> (i32, i32) {
    %c0_i32 = arith.constant 0 : i32
    %c0_i32_0 = arith.constant 0 : i32
    %c0_i32_1 = arith.constant 0 : i32
    return %c0_i32, %c0_i32_0 : i32, i32
  }
  func.func @transform_15(%arg0: i32) -> (i32, i32) {
    %c0_i32 = arith.constant 0 : i32
    %c0_i32_0 = arith.constant 0 : i32
    %c0_i32_1 = arith.constant 0 : i32
    return %c0_i32, %c0_i32_0 : i32, i32
  }
}

</mosaic_0001>

<bundles_post_ra>
// kernel: transformer_model_forward.1
= control target key start
LH: loop header
LB: loop body
LE: loop exit
PB: predicated region body
PF: predicated region fallthrough
CT: control target
= control target key end

     0   :  { %20 = vsyncpa [#allocation4], 0  ;;  %s4874_s0 = inlined_call_operand.vmem [shape: f32[2,8,128], index: 0, kind: input, shape index: {}]   ;;  %s4875_s1 = inlined_call_operand.hbm [shape: bf16[128,384], index: 1, kind: input, shape index: {}]   ;;  %s4876_s2 = inlined_call_operand.vmem [shape: f32[1,384], index: 2, kind: input, shape index: {}]   ;;  %s4877_s3 = inlined_call_operand.vmem [shape: bf16[128,128], index: 3, kind: input, shape index: {}]   ;;  %s4878_s4 = inlined_call_operand.vmem [shape: f32[1,128], index: 4, kind: input, shape index: {}]   ;;  %s4879_s5 = inlined_call_operand.vmem [shape: f32[1,128], index: 5, kind: input, shape index: {}]   ;;  %s4880_s6 = inlined_call_operand.vmem [shape: f32[1,128], index: 6, kind: input, shape index: {}]   ;;  %s4881_s7 = inlined_call_operand.hbm [shape: bf16[128,2048], index: 7, kind: input, shape index: {}]   ;;  %s4882_s8 = inlined_call_operand.vmem [shape: f32[1,2048], index: 8, kind: input, shape index: {}]   ;;  %s4883_s9 = inlined_call_operand.hbm [shape: bf16[2048,128], index: 9, kind: input, shape index: {}]   ;;  %s4884_s10 = inlined_call_operand.vmem [shape: f32[1,128], index: 10, kind: input, shape index: {}]   ;;  %s4885_s11 = inlined_call_operand.vmem [shape: f32[1,128], index: 11, kind: input, shape index: {}]   ;;  %s4886_s12 = inlined_call_operand.vmem [shape: f32[1,128], index: 12, kind: input, shape index: {}]   ;;  %s4887_s13 = inlined_call_operand.vmem [shape: f32[128,8], index: 13, kind: input, shape index: {}]   ;;  %s4888_s14 = inlined_call_operand.vmem [shape: f32[1,8], index: 14, kind: input, shape index: {}]   ;;  %s4889_s15 = inlined_call_operand.hbm [shape: f32[8,8], index: 15, kind: output, shape index: {}]  }
   0x1   :  { %21 = vsyncpa [#allocation7], 0 }
   0x2   :  { %22 = vsyncpa [#allocation5], 0  ;;  %s4471_s18 = smov [#allocation6]   ;;  %s4377_s22 = scalar_lea.hbm %s4881_s7, 16384 }
   0x3   :  { %s52_s19 = sshll.u32 %s4471_s18, 4  ;;  %p4378_p0 = scmp.ne.s32.totalorder %s4881_s7, %s4377_s22  ;;  %s53_s19 = int_to_ptr.vmem [resolvable:$true] %s52_s19 }
   0x4   :  { %p4381_p1 = scmp.lt.u32.totalorder %s4377_s22, %s4881_s7 }
   0x6   :  { %p4383_p2 = pnand %p4381_p1, %p4378_p0 }
   0x8   :  { %4386 = shalt.err (!%p4383_p2)
}
   0x9   :  { %s4387_s27 = scalar_lea.vmem %s53_s19, 16384  ;;  %p4392_p4 = scmp.lt.s32.totalorder %s53_s19, %s53_s19 }
   0xa   :  { %p4388_p3 = scmp.ne.s32.totalorder %s53_s19, %s4387_s27  ;;  %p4393_p5 = scmp.lt.s32.totalorder %s4387_s27, %s4387_s27 }
   0xc   :  { %p4394_p6 = por %p4393_p5, %p4392_p4 }
   0xe   :  { %p4395_p7 = pnand %p4394_p6, %p4388_p3 }
  0x10   :  { %4398 = shalt.err (!%p4395_p7)
}
  0x11   :  { %s4472_s28 = smov 1024   ;;  %s4473_s29 = smov 64  }
  0x12   :  { %58 = dma.hbm_to_vmem [thread:$0]  %s4881_s7, 16384, %s53_s19, [#allocation7], %s4472_s28, %s4472_s28, %s4473_s29  }
  0x13   :  { %s4474_s17 = smov [#allocation3]   ;;  %s4399_s22 = scalar_lea.hbm %s4875_s1, 3072 }
  0x14   :  { %s30_s18 = sshll.u32 %s4474_s17, 4  ;;  %p4400_p8 = scmp.ne.s32.totalorder %s4875_s1, %s4399_s22  ;;  %s31_s18 = int_to_ptr.vmem [resolvable:$true] %s30_s18 }
  0x15   :  { %p4403_p9 = scmp.lt.u32.totalorder %s4399_s22, %s4875_s1 }
  0x17   :  { %p4405_p10 = pnand %p4403_p9, %p4400_p8 }
  0x19   :  { %4408 = shalt.err (!%p4405_p10)
}
  0x1a   :  { %s4409_s27 = scalar_lea.vmem %s31_s18, 3072  ;;  %p4414_p12 = scmp.lt.s32.totalorder %s31_s18, %s31_s18 }
  0x1b   :  { %p4410_p11 = scmp.ne.s32.totalorder %s31_s18, %s4409_s27  ;;  %p4415_p13 = scmp.lt.s32.totalorder %s4409_s27, %s4409_s27 }
  0x1d   :  { %p4416_p0 = por %p4415_p13, %p4414_p12 }
  0x1f   :  { %p4417_p1 = pnand %p4416_p0, %p4410_p11 }
  0x21   :  { %4420 = shalt.err (!%p4417_p1)
}
  0x22   :  { %s4475_s7 = smov 192   ;;  %s4476_s19 = smov 12  }
  0x23   :  { %36 = dma.hbm_to_vmem [thread:$0]  %s4875_s1, 3072, %s31_s18, [#allocation4], %s4475_s7, %s4475_s7, %s4476_s19  }
  0x24   :  { %s4477_s16 = smov [#allocation8]   ;;  %s4421_s22 = scalar_lea.hbm %s4883_s9, 16384 }
  0x25   :  { %s66_s17 = sshll.u32 %s4477_s16, 4  ;;  %p4422_p2 = scmp.ne.s32.totalorder %s4883_s9, %s4421_s22  ;;  %s67_s17 = int_to_ptr.vmem [resolvable:$true] %s66_s17 }
  0x26   :  { %p4425_p3 = scmp.lt.u32.totalorder %s4421_s22, %s4883_s9 }
  0x28   :  { %p4427_p4 = pnand %p4425_p3, %p4422_p2 }
  0x2a   :  { %4430 = shalt.err (!%p4427_p4)
}
  0x2b   :  { %s4431_s27 = scalar_lea.vmem %s67_s17, 16384  ;;  %p4436_p6 = scmp.lt.s32.totalorder %s67_s17, %s67_s17 }
  0x2c   :  { %p4432_p5 = scmp.ne.s32.totalorder %s67_s17, %s4431_s27  ;;  %p4437_p7 = scmp.lt.s32.totalorder %s4431_s27, %s4431_s27 }
  0x2e   :  { %p4438_p8 = por %p4437_p7, %p4436_p6 }
  0x30   :  { %p4439_p9 = pnand %p4438_p8, %p4432_p5 }
  0x32   :  { %4442 = shalt.err (!%p4439_p9)
}
  0x33   :  { %s4478_s1 = smov 4  }
  0x34   :  { %72 = dma.hbm_to_vmem [thread:$0]  %s4883_s9, 16384, %s67_s17, [#allocation7], %s4473_s29, %s4473_s29, %s4478_s1  }
  0x35   :  { %4465 = dma.done.wait [#allocation4], 3072  }
  0x36   :  { %4466 = vsyncadd [#allocation4], 4294964224 }
  0x37   :  { %4467 = dma.done.wait [#allocation7], 32768  }
  0x38   :  { %4468 = vsyncadd [#allocation7], 4294934528  ;;  %v4479_v0 = vmov 0   ;;  %v4480_v1 = vmov 0.0   ;;  %v4193_v2 = vld [vmem:[#allocation3 + $0x4] ss:$12 sps:$4 sm:$0xff]   ;;  %v135_v29 = vlaneseq }
  0x39   :  { %310 = vmatprep.mubr.bf16.mxu0 %v4479_v0  ;;  %4059 = vmatprep.subr.bf16.mxu1 %v4480_v1  ;;  %v4195_v3 = vld [vmem:[#allocation3] ss:$12 sps:$4 sm:$0xff]   ;;  %v4196_v4 = vld [vmem:[#allocation3 + $0x1c] ss:$12 sps:$4 sm:$0xff]   ;;  %v4198_v5 = vld [vmem:[#allocation3 + $0x18] ss:$12 sps:$4 sm:$0xff]  }
  0x3a   :  { %278 = vmatprep.subr.bf16.mxu0 %v4193_v2  ;;  %v4199_v6 = vld [vmem:[#allocation3 + $0x34] ss:$12 sps:$4 sm:$0xff]   ;;  %v4201_v7 = vld [vmem:[#allocation3 + $0x30] ss:$12 sps:$4 sm:$0xff]   ;;  %v4202_v8 = vld [vmem:[#allocation3 + $0x4c] ss:$12 sps:$4 sm:$0xff]  }
  0x3b   :  { %279 = vmatpush1.bf16.msra.mxu0 %v4195_v3  ;;  %v4204_v9 = vld [vmem:[#allocation3 + $0x48] ss:$12 sps:$4 sm:$0xff]   ;;  %v4205_v10 = vld [vmem:[#allocation3 + $0x64] ss:$12 sps:$4 sm:$0xff]   ;;  %v4218_v12 = vld [vmem:[#allocation3 + $0x20] ss:$12 sps:$4 sm:$0xff]  }
  0x3c   :  { %280 = vmatprep.subr.bf16.mxu0 %v4196_v4  ;;  %v4217_v11 = vld [vmem:[#allocation3 + $0x8] ss:$12 sps:$4 sm:$0xff]   ;;  %v4207_v13 = vld [vmem:[#allocation3 + $0x60] ss:$12 sps:$4 sm:$0xff]   ;;  %v4219_v15 = vld [vmem:[#allocation3 + $0x38] ss:$12 sps:$4 sm:$0xff]  }
  0x3d   :  { %4060 = vmatpush3.bf16.msra.mxu1 %v4217_v11  ;;  %v4208_v14 = vld [vmem:[#allocation3 + $0x7c] ss:$12 sps:$4 sm:$0xff]   ;;  %v4210_v16 = vld [vmem:[#allocation3 + $0x78] ss:$12 sps:$4 sm:$0xff]   ;;  %v4211_v17 = vld [vmem:[#allocation3 + $0x94] ss:$12 sps:$4 sm:$0xff]  }
  0x3e   :  { %4061 = vmatprep.subr.bf16.mxu1 %v4480_v1  ;;  %v4220_v18 = vld [vmem:[#allocation3 + $0x50] ss:$12 sps:$4 sm:$0xff]   ;;  %v4214_v20 = vld [vmem:[#allocation3 + $0xac] ss:$12 sps:$4 sm:$0xff]   ;;  %v4221_v21 = vld [vmem:[#allocation3 + $0x68] ss:$12 sps:$4 sm:$0xff]  }
  0x3f   :  { %281 = vmatpush1.bf16.msra.mxu0 %v4198_v5  ;;  %v4213_v19 = vld [vmem:[#allocation3 + $0x90] ss:$12 sps:$4 sm:$0xff]   ;;  %v4216_v22 = vld [vmem:[#allocation3 + $0xa8] ss:$12 sps:$4 sm:$0xff]   ;;  %v4611_v23 = vld [vmem:[%s4874_s0] sm:$0xff]  ;;  %vm4481_vm0 = vmmov 0  }
  0x40   :  { %282 = vmatprep.subr.bf16.mxu0 %v4199_v6  ;;  %v4616_v24 = vld [vmem:[%s4874_s0 + $0x8] sm:$0xff]  ;;  %v4223_v27 = vld [vmem:[#allocation3 + $0x98] ss:$12 sps:$4 sm:$0xff]   ;;  %v4224_v28 = vld [vmem:[#allocation3 + $0xb0] ss:$12 sps:$4 sm:$0xff]   ;;  %4075 = vmatprep.mubr.msk.bf16.mxu1 %vm4481_vm0, %v4480_v1  ;;  %v4632_v30 = vshrl.u32 %v135_v29, 7 }
  0x41   :  { %4062 = vmatpush3.bf16.msra.mxu1 %v4218_v12  ;;  %v4222_v25 = vld [vmem:[#allocation3 + $0x80] ss:$12 sps:$4 sm:$0xff]   ;;  %v100_v26 = vpack.c.bf16 %v4616_v24, %v4611_v23  ;;  %vm532_vm1 = vcmask 1043456   ;;  %vm502_vm2 = vcmask 64512   ;;  %s4483_s7 = smov [#allocation9]  }
  0x42   :  { %4063 = vmatprep.subr.bf16.mxu1 %v4480_v1  ;;  %v4635_v31 = vsub.s32 1, %v4632_v30  ;;  %v133_v32 = vld [vmem:[%s4876_s2] sm:$0x7]  ;;  %v4641_v33 = vsub.s32 0, %v4632_v30  ;;  %v4652_v44 = vsub.s32 2, %v4632_v30 }
  0x43   :  { %283 = vmatpush1.bf16.msra.mxu0 %v4201_v7 }
  0x44   :  { %284 = vmatprep.subr.bf16.mxu0 %v4202_v8  ;;  %v142_v34 = vrot.slane %v133_v32, %v4635_v31  ;;  %v138_v36 = vrot.slane %v133_v32, %v4641_v33  ;;  %v146_v45 = vrot.slane %v133_v32, %v4652_v44 }
  0x45   :  { %4064 = vmatpush3.bf16.msra.mxu1 %v4219_v15 }
  0x46   :  { %4065 = vmatprep.subr.bf16.mxu1 %v4480_v1 }
  0x47   :  { %285 = vmatpush1.bf16.msra.mxu0 %v4204_v9 }
  0x48   :  { %286 = vmatprep.subr.bf16.mxu0 %v4205_v10 }
  0x49   :  { %4066 = vmatpush3.bf16.msra.mxu1 %v4220_v18  ;;  %v4226_v18 = vld [vmem:[%s4877_s3 + $0x8] sm:$0xff]  }
  0x4a   :  { %4067 = vmatprep.subr.bf16.mxu1 %v4480_v1 }
  0x4b   :  { %287 = vmatpush1.bf16.msra.mxu0 %v4207_v13 }
  0x4c   :  { %288 = vmatprep.subr.bf16.mxu0 %v4208_v14  ;;  %v4225_v14 = vld [vmem:[%s4877_s3] sm:$0xff]  }
  0x4d   :  { %4068 = vmatpush3.bf16.msra.mxu1 %v4221_v21  ;;  %v4228_v21 = vld [vmem:[%s4877_s3 + $0x18] sm:$0xff]  }
  0x4e   :  { %4069 = vmatprep.subr.bf16.mxu1 %v4480_v1 }
  0x4f   :  { %289 = vmatpush1.bf16.msra.mxu0 %v4210_v16 }
  0x50   :  { %290 = vmatprep.subr.bf16.mxu0 %v4211_v17 }
  0x51   :  { %4070 = vmatpush3.bf16.msra.mxu1 %v4222_v25  ;;  %v4230_v25 = vld [vmem:[%s4877_s3 + $0x28] sm:$0xff]  }
  0x52   :  { %4071 = vmatprep.subr.bf16.mxu1 %v4480_v1 }
  0x53   :  { %291 = vmatpush1.bf16.msra.mxu0 %v4213_v19 }
  0x54   :  { %292 = vmatprep.subr.bf16.mxu0 %v4214_v20  ;;  %v4227_v20 = vld [vmem:[%s4877_s3 + $0x10] sm:$0xff]  }
  0x55   :  { %4072 = vmatpush3.bf16.msra.mxu1 %v4223_v27  ;;  %v4232_v27 = vld [vmem:[%s4877_s3 + $0x38] sm:$0xff]  }
  0x56   :  { %4073 = vmatprep.subr.bf16.mxu1 %v4480_v1 }
  0x57   :  { %293 = vmatpush1.bf16.msra.mxu0 %v4216_v22  ;;  %v4229_v22 = vld [vmem:[%s4877_s3 + $0x20] sm:$0xff]  }
  0x58   :  { %4079 = vmatprep.subr.mxu0 %v4480_v1 }
  0x59   :  { %4074 = vmatpush3.bf16.msra.mxu1 %v4224_v28 }
  0x5a   :  { %311 = vmatmul.mubr.bf16.vlgmr.msra.gmra.mrb[0].mxu0 %v100_v26  ;;  %4084 = vmatprep.subr.mxu1 %v4480_v1 }
  0x5b   :  { %4081 = vmatprep.mubr.msk.f32.mxu0 %vm4481_vm0, %v4480_v1 }
  0x5c   :  { %4076 = vmatmul.mubr.bf16.vlgmr.msra.gmra.mrb[0].mxu1 %v100_v26  ;;  %v4231_v26 = vld [vmem:[%s4877_s3 + $0x30] sm:$0xff]  }
  0x5d   :  { %4086 = vmatprep.mubr.msk.f32.mxu1 %vm4481_vm0, %v4480_v1 }
 0x12d   :  { %v312_v35 = vpop.f32.mrb[0].mxu0 }
 0x12e   :  { %v314_v37 = vpop.f32.mrb[1].mxu0  ;;  %v313_v42 = vadd.f32 %v312_v35, %v138_v36 }
 0x12f   :  { %v315_v38 = vadd.f32 %v314_v37, %v142_v34  ;;  %v316_v39 = vpop.f32.mrb[2].mxu0  ;;  %v355_v46 = vpop.f32.mrb[0].mxu1 }
 0x130   :  { %v318_v40 = vpop.f32.mrb[3].mxu0  ;;  %v317_v43 = vadd.f32 %v316_v39, %v138_v36  ;;  %v356_v47 = vadd.f32 %v355_v46, %v146_v45  ;;  %v4077_v48 = vpop.f32.mrb[1].mxu1 }
 0x131   :  { %v319_v41 = vadd.f32 %v318_v40, %v142_v34  ;;  %4080 = vmatpush3.xpose.msra.mxu0 %v315_v38  ;;  %v358_v49 = vpop.f32.mrb[2].mxu1  ;;  %v3569_v40 = vld [vmem:[%s4878_s4] ss:$0 sm:$0xff] }
 0x132   :  { %4089 = vmatprep.subr.bf16.mxu0 %v4480_v1  ;;  %v527_v50 = vpack.c.bf16 %v356_v47, %v356_v47  ;;  %v359_v51 = vadd.f32 %v358_v49, %v146_v45  ;;  %v4078_v52 = vpop.f32.mrb[3].mxu1 }
 0x133   :  { %4085 = vmatpush3.xpose.msra.mxu1 %v319_v41  ;;  %v780_v52 = vld [vmem:[#allocation6 + $0x8] sm:$0xff] }
 0x134   :  { %4082 = vmatmul.mubr.f32.vlgmr.msra.gmra.mrb[4].mxu0 %v313_v42  ;;  %4095 = vmatprep.subr.bf16.mxu1 %v4480_v1  ;;  %v534_v53 = vsel %vm532_vm1, %v527_v50, 0  ;;  %v528_v54 = vpack.c.bf16 %v359_v51, %v359_v51  ;;  %v779_v50 = vld [vmem:[#allocation6] sm:$0xff] }
 0x135   :  { %4091 = vmatprep.mubr.msk.bf16.mxu0 %vm4481_vm0, %v4480_v1  ;;  %4090 = vmatpush3.bf16.msra.mxu0 %v534_v53  ;;  %v787_v51 = vld [vmem:[#allocation6 + $0x40] sm:$0xff] }
 0x136   :  { %4087 = vmatmul.mubr.f32.vlgmr.msra.gmra.mrb[4].mxu1 %v317_v43  ;;  %v580_v55 = vsel %vm532_vm1, %v528_v54, 0  ;;  %4101 = vmatprep.subr.bf16.mxu0 %v4480_v1  ;;  %v3580_v53 = vcombine.low %v779_v50, %v787_v51  ;;  %v3581_v54 = vcombine.high %v779_v50, %v787_v51  ;;  %v876_v50 = vld [vmem:[#allocation6 + $0x308] sm:$0xff] }
 0x137   :  { %4097 = vmatprep.mubr.msk.bf16.mxu1 %vm4481_vm0, %v4480_v1  ;;  %4096 = vmatpush3.bf16.msra.mxu1 %v580_v55  ;;  %v788_v55 = vld [vmem:[#allocation6 + $0x48] sm:$0xff] }
 0x138   :  { %1631 = vmatprep.subr.bf16.mxu1 %v3581_v54 }
 0x207   :  { %v428_v56 = vpop.f32.mrb[4].mxu0 }
 0x208   :  { %v4083_v57 = vpop.f32.mrb[5].mxu0  ;;  %v503_v58 = vsel %vm502_vm2, %v428_v56, -inf }
 0x209   :  { %v498_v59 = vpop.f32.mrb[4].mxu1  ;;  %504 = vmax.xlane.f32.xlu0 %v503_v58  ;;  %v803_v57 = vld [vmem:[#allocation6 + $0xc0] sm:$0xff]  ;;  %v3582_v58 = vcombine.low %v780_v52, %v788_v55 }
 0x20a   :  { %v4088_v60 = vpop.f32.mrb[5].mxu1  ;;  %v506_v61 = vsel %vm502_vm2, %v498_v59, -inf }
 0x20d   :  { %507 = vmax.xlane.f32.xlu0 %v506_v61  ;;  %v796_v61 = vld [vmem:[#allocation6 + $0x88] sm:$0xff] }
 0x296   :  { %v505_v62 = vpop.xlane.xlu0 %504 }
 0x297   :  { %v509_v63 = vsub.f32 %v428_v56, %v505_v62  ;;  %v795_v56 = vld [vmem:[#allocation6 + $0x80] sm:$0xff]  ;;  %v804_v62 = vld [vmem:[#allocation6 + $0xc8] sm:$0xff] }
 0x298   :  { %v3597_v60 = vcombine.high %v795_v56, %v803_v57 }
 0x299   :  { %v511_v2 = vmul.f32 1.442695, %v509_v63  ;;  %v3599_v63 = vcombine.high %v796_v61, %v804_v62 }
 0x29a   :  { %v508_v3 = vpop.xlane.xlu0 %507 }
 0x29b   :  { %4361 = vpow2.f32 %v511_v2  ;;  %v510_v4 = vsub.f32 %v498_v59, %v508_v3  ;;  %v3583_v59 = vcombine.high %v780_v52, %v788_v55  ;;  %v884_v52 = vld [vmem:[#allocation6 + $0x348] sm:$0xff] }
 0x29c   :  { %v3678_v54 = vcombine.low %v876_v50, %v884_v52  ;;  %v3679_v55 = vcombine.high %v876_v50, %v884_v52 }
 0x29d   :  { %v513_v5 = vmul.f32 1.442695, %v510_v4 }
 0x29f   :  { %4363 = vpow2.f32 %v513_v5 }
 0x2a5   :  { %v4362_v6 = vpop.eup %4361 }
 0x2a6   :  { %v515_v7 = vsel %vm502_vm2, %v4362_v6, 0.0 }
 0x2a7   :  { %516 = vadd.xlane.f32.xlu1 %v515_v7 }
 0x2a9   :  { %v4364_v8 = vpop.eup %4363 }
 0x2aa   :  { %v518_v9 = vsel %vm502_vm2, %v4364_v8, 0.0 }
 0x2ab   :  { %519 = vadd.xlane.f32.xlu1 %v518_v9 }
 0x334   :  { %v517_v10 = vpop.xlane.xlu1 %516 }
 0x335   :  { %4365 = vrcp.f32 %v517_v10  ;;  %v811_v10 = vld [vmem:[#allocation6 + $0x100] sm:$0xff] }
 0x338   :  { %v520_v11 = vpop.xlane.xlu1 %519 }
 0x339   :  { %4367 = vrcp.f32 %v520_v11  ;;  %v819_v11 = vld [vmem:[#allocation6 + $0x140] sm:$0xff] }
 0x33f   :  { %v4366_v12 = vpop.eup %4365 }
 0x340   :  { %v523_v13 = vmul.f32 %v4366_v12, %v4362_v6  ;;  %v812_v12 = vld [vmem:[#allocation6 + $0x108] sm:$0xff] }
 0x342   :  { %v525_v15 = vpack.c.bf16 %v523_v13, %v523_v13  ;;  %v3613_v13 = vcombine.high %v811_v10, %v819_v11 }
 0x343   :  { %v4368_v16 = vpop.eup %4367 }
 0x344   :  { %v524_v17 = vmul.f32 %v4368_v16, %v4364_v8  ;;  %4092 = vmatmul.mubr.msk.bf16.vlgmr.msra.gmra.mrb[8].mxu0 %vm502_vm2, %v525_v15  ;;  %v3612_v15 = vcombine.low %v811_v10, %v819_v11 }
 0x345   :  { %4102 = vmatpush3.bf16.msra.mxu0 %v4225_v14  ;;  %4117 = vmatprep.mubr.msk.bf16.mxu0 %vm4481_vm0, %v4480_v1  ;;  %v820_v14 = vld [vmem:[#allocation6 + $0x148] sm:$0xff] }
 0x346   :  { %v526_v19 = vpack.c.bf16 %v524_v17, %v524_v17  ;;  %4103 = vmatprep.subr.bf16.mxu0 %v4480_v1  ;;  %v3614_v16 = vcombine.low %v812_v12, %v820_v14  ;;  %v3615_v17 = vcombine.high %v812_v12, %v820_v14 }
 0x348   :  { %4098 = vmatmul.mubr.msk.bf16.vlgmr.msra.gmra.mrb[8].mxu1 %vm502_vm2, %v526_v19  ;;  %v835_v19 = vld [vmem:[#allocation6 + $0x1c0] sm:$0xff] }
 0x349   :  { %4104 = vmatpush3.bf16.msra.mxu0 %v4226_v18  ;;  %1663 = vmatprep.mubr.bf16.mxu1 %v4479_v0  ;;  %v827_v18 = vld [vmem:[#allocation6 + $0x180] sm:$0xff] }
 0x34a   :  { %4105 = vmatprep.subr.bf16.mxu0 %v4480_v1  ;;  %1632 = vmatpush1.bf16.msra.mxu1 %v3580_v53 }
 0x34b   :  { %1633 = vmatprep.subr.bf16.mxu1 %v3597_v60  ;;  %v900_v60 = vld [vmem:[#allocation6 + $0x3c8] sm:$0xff] }
 0x34d   :  { %4106 = vmatpush3.bf16.msra.mxu0 %v4227_v20  ;;  %v828_v20 = vld [vmem:[#allocation6 + $0x188] sm:$0xff] }
 0x34e   :  { %4107 = vmatprep.subr.bf16.mxu0 %v4480_v1 }
 0x351   :  { %4108 = vmatpush3.bf16.msra.mxu0 %v4228_v21  ;;  %v3629_v21 = vcombine.high %v827_v18, %v835_v19 }
 0x352   :  { %4109 = vmatprep.subr.bf16.mxu0 %v4480_v1 }
 0x355   :  { %4110 = vmatpush3.bf16.msra.mxu0 %v4229_v22  ;;  %v836_v22 = vld [vmem:[#allocation6 + $0x1c8] sm:$0xff] }
 0x356   :  { %4111 = vmatprep.subr.bf16.mxu0 %v4480_v1 }
 0x359   :  { %4112 = vmatpush3.bf16.msra.mxu0 %v4230_v25  ;;  %v3628_v25 = vcombine.low %v827_v18, %v835_v19 }
 0x35a   :  { %4113 = vmatprep.subr.bf16.mxu0 %v4480_v1 }
 0x35d   :  { %4114 = vmatpush3.bf16.msra.mxu0 %v4231_v26  ;;  %v3630_v26 = vcombine.low %v828_v20, %v836_v22 }
 0x35e   :  { %4115 = vmatprep.subr.bf16.mxu0 %v4480_v1 }
 0x361   :  { %4116 = vmatpush3.bf16.msra.mxu0 %v4232_v27  ;;  %v3631_v27 = vcombine.high %v828_v20, %v836_v22  ;;  %v3579_v22 = vld [vmem:[%s4880_s6] ss:$0 sm:$0xff] }
 0x362   :  { %1674 = vmatprep.subr.bf16.mxu0 %v3583_v59 }
 0x417   :  { %v570_v28 = vpop.f32.mrb[8].mxu0 }
 0x418   :  { %v4093_v29 = vpop.f32.mrb[9].mxu0 }
 0x419   :  { %v573_v32 = vpop.f32.mrb[10].mxu0  ;;  %v851_v29 = vld [vmem:[#allocation6 + $0x240] sm:$0xff] }
 0x41a   :  { %v4094_v34 = vpop.f32.mrb[11].mxu0  ;;  %v844_v32 = vld [vmem:[#allocation6 + $0x208] sm:$0xff] }
 0x41b   :  { %v616_v35 = vpop.f32.mrb[8].mxu1 }
 0x41c   :  { %v622_v36 = vpack.c.bf16 %v616_v35, %v570_v28  ;;  %v4099_v37 = vpop.f32.mrb[9].mxu1  ;;  %v843_v28 = vld [vmem:[#allocation6 + $0x200] sm:$0xff]  ;;  %v852_v35 = vld [vmem:[#allocation6 + $0x248] sm:$0xff] }
 0x41d   :  { %v619_v38 = vpop.f32.mrb[10].mxu1  ;;  %v3645_v34 = vcombine.high %v843_v28, %v851_v29  ;;  %v3646_v37 = vcombine.low %v844_v32, %v852_v35 }
 0x41e   :  { %v4100_v39 = vpop.f32.mrb[11].mxu1  ;;  %4118 = vmatmul.mubr.bf16.vlgmr.msra.gmra.mrb[12].mxu0 %v622_v36  ;;  %v3644_v36 = vcombine.low %v843_v28, %v851_v29  ;;  %v3647_v38 = vcombine.high %v844_v32, %v852_v35  ;;  %v798_v28 = vld [vmem:[#allocation6 + $0x98] sm:$0xff] }
 0x41f   :  { %1706 = vmatprep.mubr.bf16.mxu0 %v4479_v0  ;;  %1675 = vmatpush1.bf16.msra.mxu0 %v3582_v58  ;;  %v859_v39 = vld [vmem:[#allocation6 + $0x280] sm:$0xff]  ;;  %v892_v58 = vld [vmem:[#allocation6 + $0x388] sm:$0xff]  ;;  %v806_v29 = vld [vmem:[#allocation6 + $0xd8] sm:$0xff] }
 0x420   :  { %1676 = vmatprep.subr.bf16.mxu0 %v3599_v63  ;;  %v3695_v63 = vcombine.high %v892_v58, %v900_v60 }
 0x4f1   :  { %v728_v41 = vpop.f32.mrb[12].mxu0 }
 0x4f2   :  { %v729_v42 = vadd.f32 %v3569_v40, %v728_v41  ;;  %v4119_v43 = vpop.f32.mrb[13].mxu0  ;;  %v860_v41 = vld [vmem:[#allocation6 + $0x288] sm:$0xff] }
 0x4f3   :  { %v731_v45 = vpop.f32.mrb[14].mxu0  ;;  %v868_v43 = vld [vmem:[#allocation6 + $0x2c8] sm:$0xff] }
 0x4f4   :  { %v732_v46 = vadd.f32 %v3569_v40, %v731_v45  ;;  %v4120_v47 = vpop.f32.mrb[15].mxu0  ;;  %v735_v48 = vadd.f32 %v729_v42, %v4611_v23  ;;  %v3596_v23 = vcombine.low %v795_v56, %v803_v57  ;;  %v867_v40 = vld [vmem:[#allocation6 + $0x2c0] sm:$0xff] }
 0x4f5   :  { %v3661_v42 = vcombine.high %v859_v39, %v867_v40  ;;  %v3660_v45 = vcombine.low %v859_v39, %v867_v40  ;;  %v3663_v47 = vcombine.high %v860_v41, %v868_v43  ;;  %v891_v56 = vld [vmem:[#allocation6 + $0x380] sm:$0xff]  ;;  %v822_v39 = vld [vmem:[#allocation6 + $0x158] sm:$0xff] }
 0x4f6   :  { %737 = vadd.xlane.f32.xlu0 %v735_v48  ;;  %v736_v49 = vadd.f32 %v732_v46, %v4616_v24  ;;  %v3598_v24 = vcombine.low %v796_v61, %v804_v62  ;;  %1634 = vmatpush1.bf16.msra.mxu1 %v3596_v23  ;;  %v3662_v46 = vcombine.low %v860_v41, %v868_v43  ;;  %v899_v57 = vld [vmem:[#allocation6 + $0x3c0] sm:$0xff]  ;;  %v781_v23 = vld [vmem:[#allocation6 + $0x10] sm:$0xff] }
 0x4f7   :  { %1635 = vmatprep.subr.bf16.mxu1 %v3613_v13  ;;  %v3693_v59 = vcombine.high %v891_v56, %v899_v57  ;;  %v3692_v61 = vcombine.low %v891_v56, %v899_v57  ;;  %v3694_v62 = vcombine.low %v892_v58, %v900_v60  ;;  %v3602_v41 = vcombine.low %v798_v28, %v806_v29  ;;  %v854_v56 = vld [vmem:[#allocation6 + $0x258] sm:$0xff] }
 0x4f8   :  { %739 = vadd.xlane.f32.xlu1 %v736_v49  ;;  %1677 = vmatpush1.bf16.msra.mxu0 %v3598_v24  ;;  %v789_v24 = vld [vmem:[#allocation6 + $0x50] sm:$0xff] }
 0x4f9   :  { %1678 = vmatprep.subr.bf16.mxu0 %v3615_v17  ;;  %v3578_v17 = vld [vmem:[%s4879_s5] ss:$0 sm:$0xff] }
 0x4fa   :  { %1636 = vmatpush1.bf16.msra.mxu1 %v3612_v15 }
 0x4fb   :  { %1637 = vmatprep.subr.bf16.mxu1 %v3629_v21 }
 0x4fc   :  { %1679 = vmatpush1.bf16.msra.mxu0 %v3614_v16 }
 0x4fd   :  { %1680 = vmatprep.subr.bf16.mxu0 %v3631_v27  ;;  %v805_v27 = vld [vmem:[#allocation6 + $0xd0] sm:$0xff] }
 0x4fe   :  { %1638 = vmatpush1.bf16.msra.mxu1 %v3628_v25 }
 0x4ff   :  { %1639 = vmatprep.subr.bf16.mxu1 %v3645_v34 }
 0x500   :  { %1681 = vmatpush1.bf16.msra.mxu0 %v3630_v26  ;;  %v797_v26 = vld [vmem:[#allocation6 + $0x90] sm:$0xff] }
 0x501   :  { %1682 = vmatprep.subr.bf16.mxu0 %v3647_v38  ;;  %v3601_v35 = vcombine.high %v797_v26, %v805_v27  ;;  %v814_v38 = vld [vmem:[#allocation6 + $0x118] sm:$0xff]  ;;  %v3600_v40 = vcombine.low %v797_v26, %v805_v27  ;;  %v791_v26 = vld [vmem:[#allocation6 + $0x60] sm:$0xff]  ;;  %v784_v27 = vld [vmem:[#allocation6 + $0x28] sm:$0xff] }
 0x502   :  { %1640 = vmatpush1.bf16.msra.mxu1 %v3644_v36  ;;  %v3603_v36 = vcombine.high %v798_v28, %v806_v29  ;;  %v3619_v43 = vcombine.high %v814_v38, %v822_v39  ;;  %v3618_v50 = vcombine.low %v814_v38, %v822_v39  ;;  %v792_v28 = vld [vmem:[#allocation6 + $0x68] sm:$0xff]  ;;  %v807_v38 = vld [vmem:[#allocation6 + $0xe0] sm:$0xff] }
 0x503   :  { %1641 = vmatprep.subr.bf16.mxu1 %v3661_v42  ;;  %v800_v39 = vld [vmem:[#allocation6 + $0xa8] sm:$0xff] }
 0x504   :  { %1683 = vmatpush1.bf16.msra.mxu0 %v3646_v37  ;;  %v821_v37 = vld [vmem:[#allocation6 + $0x150] sm:$0xff] }
 0x505   :  { %1684 = vmatprep.subr.bf16.mxu0 %v3663_v47  ;;  %v830_v47 = vld [vmem:[#allocation6 + $0x198] sm:$0xff] }
 0x506   :  { %1642 = vmatpush1.bf16.msra.mxu1 %v3660_v45  ;;  %v829_v45 = vld [vmem:[#allocation6 + $0x190] sm:$0xff] }
 0x508   :  { %1685 = vmatpush1.bf16.msra.mxu0 %v3662_v46  ;;  %v837_v46 = vld [vmem:[#allocation6 + $0x1d0] sm:$0xff] }
 0x509   :  { %1686 = vmatprep.subr.bf16.mxu0 %v3679_v55  ;;  %v846_v55 = vld [vmem:[#allocation6 + $0x218] sm:$0xff]  ;;  %v3632_v57 = vcombine.low %v829_v45, %v837_v46 }
 0x50a   :  { %v3651_v60 = vcombine.high %v846_v55, %v854_v56 }
 0x50c   :  { %1687 = vmatpush1.bf16.msra.mxu0 %v3678_v54  ;;  %v853_v54 = vld [vmem:[#allocation6 + $0x250] sm:$0xff] }
 0x50d   :  { %1688 = vmatprep.subr.bf16.mxu0 %v3695_v63  ;;  %v862_v63 = vld [vmem:[#allocation6 + $0x298] sm:$0xff] }
 0x510   :  { %1689 = vmatpush1.bf16.msra.mxu0 %v3694_v62  ;;  %v869_v62 = vld [vmem:[#allocation6 + $0x2d0] sm:$0xff] }
 0x583   :  { %v738_v2 = vpop.xlane.xlu0 %737 }
 0x584   :  { %v742_v3 = vmul.f32 0.0078125, %v738_v2  ;;  %v782_v2 = vld [vmem:[#allocation6 + $0x18] sm:$0xff] }
 0x585   :  { %v740_v4 = vpop.xlane.xlu1 %739 }
 0x586   :  { %v4702_v5 = vsub.f32 %v735_v48, %v742_v3  ;;  %v743_v6 = vmul.f32 0.0078125, %v740_v4  ;;  %v875_v48 = vld [vmem:[#allocation6 + $0x300] sm:$0xff]  ;;  %v3585_v3 = vcombine.high %v781_v23, %v789_v24  ;;  %v790_v4 = vld [vmem:[#allocation6 + $0x58] sm:$0xff] }
 0x588   :  { %v4704_v7 = vsub.f32 %v736_v49, %v743_v6  ;;  %v746_v8 = vmul.f32 %v4702_v5, %v4702_v5  ;;  %v883_v49 = vld [vmem:[#allocation6 + $0x340] sm:$0xff]  ;;  %v3584_v6 = vcombine.low %v781_v23, %v789_v24  ;;  %v870_v23 = vld [vmem:[#allocation6 + $0x2d8] sm:$0xff] }
 0x589   :  { %v3677_v51 = vcombine.high %v875_v48, %v883_v49  ;;  %v3676_v53 = vcombine.low %v875_v48, %v883_v49  ;;  %v838_v48 = vld [vmem:[#allocation6 + $0x1d8] sm:$0xff] }
 0x58a   :  { %748 = vadd.xlane.f32.xlu0 %v746_v8  ;;  %v747_v9 = vmul.f32 %v4704_v7, %v4704_v7  ;;  %v3586_v8 = vcombine.low %v782_v2, %v790_v4  ;;  %v3635_v52 = vcombine.high %v830_v47, %v838_v48  ;;  %v3634_v58 = vcombine.low %v830_v47, %v838_v48  ;;  %v823_v47 = vld [vmem:[#allocation6 + $0x160] sm:$0xff]  ;;  %v816_v48 = vld [vmem:[#allocation6 + $0x128] sm:$0xff] }
 0x58b   :  { %1643 = vmatprep.subr.bf16.mxu1 %v3677_v51  ;;  %v3633_v51 = vcombine.high %v829_v45, %v837_v46  ;;  %v815_v46 = vld [vmem:[#allocation6 + $0x120] sm:$0xff] }
 0x58c   :  { %750 = vadd.xlane.f32.xlu1 %v747_v9  ;;  %1644 = vmatpush1.bf16.msra.mxu1 %v3676_v53  ;;  %v3587_v9 = vcombine.high %v782_v2, %v790_v4  ;;  %v845_v53 = vld [vmem:[#allocation6 + $0x210] sm:$0xff]  ;;  %v3650_v2 = vcombine.low %v846_v55, %v854_v56  ;;  %v3667_v4 = vcombine.high %v862_v63, %v870_v23  ;;  %v839_v55 = vld [vmem:[#allocation6 + $0x1e0] sm:$0xff]  ;;  %v832_v56 = vld [vmem:[#allocation6 + $0x1a8] sm:$0xff] }
 0x58d   :  { %1645 = vmatprep.subr.bf16.mxu1 %v3693_v59  ;;  %v3649_v59 = vcombine.high %v845_v53, %v853_v54  ;;  %v3648_v24 = vcombine.low %v845_v53, %v853_v54  ;;  %v831_v54 = vld [vmem:[#allocation6 + $0x1a0] sm:$0xff] }
 0x58e   :  { %1760 = vmatprep.subr.bf16.mxu0 %v3587_v9  ;;  %v878_v9 = vld [vmem:[#allocation6 + $0x318] sm:$0xff] }
 0x590   :  { %1646 = vmatpush1.bf16.msra.mxu1 %v3692_v61  ;;  %v861_v61 = vld [vmem:[#allocation6 + $0x290] sm:$0xff] }
 0x591   :  { %1717 = vmatprep.subr.bf16.mxu1 %v3585_v3  ;;  %v3665_v3 = vcombine.high %v861_v61, %v869_v62 }
 0x617   :  { %v749_v10 = vpop.xlane.xlu0 %748 }
 0x618   :  { %v752_v11 = vmul.f32 0.0078125, %v749_v10  ;;  %v886_v10 = vld [vmem:[#allocation6 + $0x358] sm:$0xff] }
 0x619   :  { %v751_v12 = vpop.xlane.xlu1 %750 }
 0x61a   :  { %v754_v13 = vadd.f32 1e-05, %v752_v11  ;;  %v753_v14 = vmul.f32 0.0078125, %v751_v12  ;;  %v3664_v11 = vcombine.low %v861_v61, %v869_v62  ;;  %v3666_v12 = vcombine.low %v862_v63, %v870_v23  ;;  %v847_v62 = vld [vmem:[#allocation6 + $0x220] sm:$0xff]  ;;  %v848_v23 = vld [vmem:[#allocation6 + $0x228] sm:$0xff] }
 0x61b   :  { %v855_v63 = vld [vmem:[#allocation6 + $0x260] sm:$0xff] }
 0x61c   :  { %4369 = vrsqrt.f32 %v754_v13  ;;  %v755_v15 = vadd.f32 1e-05, %v753_v14  ;;  %v3683_v14 = vcombine.high %v878_v9, %v886_v10 }
 0x61e   :  { %4371 = vrsqrt.f32 %v755_v15  ;;  %v893_v15 = vld [vmem:[#allocation6 + $0x390] sm:$0xff] }
 0x626   :  { %v4370_v16 = vpop.eup %4369 }
 0x627   :  { %v758_v18 = vmul.f32 %v4370_v16, %v4702_v5  ;;  %v901_v16 = vld [vmem:[#allocation6 + $0x3d0] sm:$0xff] }
 0x628   :  { %v4372_v19 = vpop.eup %4371  ;;  %v3696_v29 = vcombine.low %v893_v15, %v901_v16 }
 0x629   :  { %v767_v20 = vmul.f32 %v3578_v17, %v758_v18  ;;  %v759_v21 = vmul.f32 %v4372_v19, %v4704_v7  ;;  %v813_v7 = vld [vmem:[#allocation6 + $0x110] sm:$0xff]  ;;  %v902_v18 = vld [vmem:[#allocation6 + $0x3d8] sm:$0xff] }
 0x62a   :  { %v3617_v42 = vcombine.high %v813_v7, %v821_v37  ;;  %v3616_v49 = vcombine.low %v813_v7, %v821_v37  ;;  %v3591_v7 = vcombine.high %v784_v27, %v792_v28  ;;  %v799_v37 = vld [vmem:[#allocation6 + $0xa0] sm:$0xff] }
 0x62b   :  { %v768_v25 = vmul.f32 %v3578_v17, %v759_v21  ;;  %v4718_v32 = vadd.f32 %v3579_v22, %v767_v20  ;;  %v894_v17 = vld [vmem:[#allocation6 + $0x398] sm:$0xff]  ;;  %v3682_v20 = vcombine.low %v878_v9, %v886_v10  ;;  %v3697_v21 = vcombine.high %v893_v15, %v901_v16  ;;  %v871_v9 = vld [vmem:[#allocation6 + $0x2e0] sm:$0xff]  ;;  %v864_v10 = vld [vmem:[#allocation6 + $0x2a8] sm:$0xff] }
 0x62c   :  { %v879_v16 = vld [vmem:[#allocation6 + $0x320] sm:$0xff] }
 0x62d   :  { %v4720_v34 = vadd.f32 %v3579_v22, %v768_v25  ;;  %v3699_v22 = vcombine.high %v894_v17, %v902_v18  ;;  %v783_v25 = vld [vmem:[#allocation6 + $0x20] sm:$0xff] }
 0x62f   :  { %v4724_v5 = vpack.c.bf16 %v4720_v34, %v4718_v32 }
 0x631   :  { %1664 = vmatmul.mubr.bf16.vlgmr.msra.gmra.mrb[12].mxu1 %v4724_v5  ;;  %1707 = vmatmul.mubr.bf16.vlgmr.msra.gmra.mrb[16].mxu0 %v4724_v5 }
 0x632   :  { %1718 = vmatpush1.bf16.msra.mxu1 %v3584_v6  ;;  %1761 = vmatpush1.bf16.msra.mxu0 %v3586_v8  ;;  %v877_v6 = vld [vmem:[#allocation6 + $0x310] sm:$0xff] }
 0x633   :  { %1719 = vmatprep.subr.bf16.mxu1 %v3601_v35  ;;  %1762 = vmatprep.subr.bf16.mxu0 %v3603_v36  ;;  %v885_v8 = vld [vmem:[#allocation6 + $0x350] sm:$0xff]  ;;  %v3698_v35 = vcombine.low %v894_v17, %v902_v18  ;;  %v3589_v36 = vcombine.high %v783_v25, %v791_v26  ;;  %v887_v17 = vld [vmem:[#allocation6 + $0x360] sm:$0xff]  ;;  %v880_v18 = vld [vmem:[#allocation6 + $0x328] sm:$0xff] }
 0x634   :  { %1749 = vmatprep.mubr.bf16.mxu1 %v4479_v0  ;;  %1792 = vmatprep.mubr.bf16.mxu0 %v4479_v0  ;;  %v3681_v13 = vcombine.high %v877_v6, %v885_v8  ;;  %v3680_v19 = vcombine.low %v877_v6, %v885_v8  ;;  %v863_v8 = vld [vmem:[#allocation6 + $0x2a0] sm:$0xff] }
 0x636   :  { %1720 = vmatpush1.bf16.msra.mxu1 %v3600_v40  ;;  %1763 = vmatpush1.bf16.msra.mxu0 %v3602_v41  ;;  %v808_v40 = vld [vmem:[#allocation6 + $0xe8] sm:$0xff]  ;;  %v3588_v41 = vcombine.low %v783_v25, %v791_v26  ;;  %v895_v26 = vld [vmem:[#allocation6 + $0x3a0] sm:$0xff] }
 0x637   :  { %1721 = vmatprep.subr.bf16.mxu1 %v3617_v42  ;;  %1764 = vmatprep.subr.bf16.mxu0 %v3619_v43  ;;  %v3590_v42 = vcombine.low %v784_v27, %v792_v28  ;;  %v3605_v43 = vcombine.high %v799_v37, %v807_v38  ;;  %v3607_v45 = vcombine.high %v800_v39, %v808_v40  ;;  %v903_v27 = vld [vmem:[#allocation6 + $0x3e0] sm:$0xff]  ;;  %v896_v28 = vld [vmem:[#allocation6 + $0x3a8] sm:$0xff] }
 0x63a   :  { %1722 = vmatpush1.bf16.msra.mxu1 %v3616_v49  ;;  %1765 = vmatpush1.bf16.msra.mxu0 %v3618_v50  ;;  %v824_v49 = vld [vmem:[#allocation6 + $0x168] sm:$0xff]  ;;  %v3604_v50 = vcombine.low %v799_v37, %v807_v38  ;;  %v785_v38 = vld [vmem:[#allocation6 + $0x30] sm:$0xff] }
 0x63b   :  { %1723 = vmatprep.subr.bf16.mxu1 %v3633_v51  ;;  %1766 = vmatprep.subr.bf16.mxu0 %v3635_v52  ;;  %v3606_v51 = vcombine.low %v800_v39, %v808_v40  ;;  %v3621_v52 = vcombine.high %v815_v46, %v823_v47  ;;  %v3623_v53 = vcombine.high %v816_v48, %v824_v49  ;;  %v793_v39 = vld [vmem:[#allocation6 + $0x70] sm:$0xff]  ;;  %v786_v40 = vld [vmem:[#allocation6 + $0x38] sm:$0xff] }
 0x63e   :  { %1724 = vmatpush1.bf16.msra.mxu1 %v3632_v57  ;;  %1767 = vmatpush1.bf16.msra.mxu0 %v3634_v58  ;;  %v840_v57 = vld [vmem:[#allocation6 + $0x1e8] sm:$0xff]  ;;  %v3620_v58 = vcombine.low %v815_v46, %v823_v47  ;;  %v801_v47 = vld [vmem:[#allocation6 + $0xb0] sm:$0xff] }
 0x63f   :  { %1725 = vmatprep.subr.bf16.mxu1 %v3649_v59  ;;  %1768 = vmatprep.subr.bf16.mxu0 %v3651_v60  ;;  %v3622_v59 = vcombine.low %v816_v48, %v824_v49  ;;  %v3637_v60 = vcombine.high %v831_v54, %v839_v55  ;;  %v3639_v61 = vcombine.high %v832_v56, %v840_v57  ;;  %v809_v48 = vld [vmem:[#allocation6 + $0xf0] sm:$0xff]  ;;  %v802_v49 = vld [vmem:[#allocation6 + $0xb8] sm:$0xff] }
 0x642   :  { %1726 = vmatpush1.bf16.msra.mxu1 %v3648_v24  ;;  %1769 = vmatpush1.bf16.msra.mxu0 %v3650_v2  ;;  %v856_v24 = vld [vmem:[#allocation6 + $0x268] sm:$0xff]  ;;  %v3636_v2 = vcombine.low %v831_v54, %v839_v55  ;;  %v817_v55 = vld [vmem:[#allocation6 + $0x130] sm:$0xff] }
 0x643   :  { %1727 = vmatprep.subr.bf16.mxu1 %v3665_v3  ;;  %1770 = vmatprep.subr.bf16.mxu0 %v3667_v4  ;;  %v3638_v3 = vcombine.low %v832_v56, %v840_v57  ;;  %v3653_v4 = vcombine.high %v847_v62, %v855_v63  ;;  %v3655_v6 = vcombine.high %v848_v23, %v856_v24  ;;  %v825_v56 = vld [vmem:[#allocation6 + $0x170] sm:$0xff]  ;;  %v818_v57 = vld [vmem:[#allocation6 + $0x138] sm:$0xff] }
 0x646   :  { %1728 = vmatpush1.bf16.msra.mxu1 %v3664_v11  ;;  %1771 = vmatpush1.bf16.msra.mxu0 %v3666_v12  ;;  %v872_v11 = vld [vmem:[#allocation6 + $0x2e8] sm:$0xff]  ;;  %v3652_v12 = vcombine.low %v847_v62, %v855_v63  ;;  %v833_v63 = vld [vmem:[#allocation6 + $0x1b0] sm:$0xff] }
 0x647   :  { %1729 = vmatprep.subr.bf16.mxu1 %v3681_v13  ;;  %1772 = vmatprep.subr.bf16.mxu0 %v3683_v14  ;;  %v3654_v13 = vcombine.low %v848_v23, %v856_v24  ;;  %v3669_v14 = vcombine.high %v863_v8, %v871_v9  ;;  %v3671_v15 = vcombine.high %v864_v10, %v872_v11  ;;  %v841_v23 = vld [vmem:[#allocation6 + $0x1f0] sm:$0xff]  ;;  %v834_v24 = vld [vmem:[#allocation6 + $0x1b8] sm:$0xff] }
 0x64a   :  { %1730 = vmatpush1.bf16.msra.mxu1 %v3680_v19  ;;  %1773 = vmatpush1.bf16.msra.mxu0 %v3682_v20  ;;  %v888_v19 = vld [vmem:[#allocation6 + $0x368] sm:$0xff]  ;;  %v3668_v20 = vcombine.low %v863_v8, %v871_v9  ;;  %v849_v9 = vld [vmem:[#allocation6 + $0x230] sm:$0xff] }
 0x64b   :  { %1731 = vmatprep.subr.bf16.mxu1 %v3697_v21  ;;  %1774 = vmatprep.subr.bf16.mxu0 %v3699_v22  ;;  %v3670_v21 = vcombine.low %v864_v10, %v872_v11  ;;  %v3685_v22 = vcombine.high %v879_v16, %v887_v17  ;;  %v3687_v25 = vcombine.high %v880_v18, %v888_v19  ;;  %v857_v10 = vld [vmem:[#allocation6 + $0x270] sm:$0xff]  ;;  %v850_v11 = vld [vmem:[#allocation6 + $0x238] sm:$0xff] }
 0x64e   :  { %1732 = vmatpush1.bf16.msra.mxu1 %v3696_v29  ;;  %1775 = vmatpush1.bf16.msra.mxu0 %v3698_v35  ;;  %v904_v29 = vld [vmem:[#allocation6 + $0x3e8] sm:$0xff]  ;;  %v3684_v35 = vcombine.low %v879_v16, %v887_v17  ;;  %v865_v16 = vld [vmem:[#allocation6 + $0x2b0] sm:$0xff] }
 0x64f   :  { %1803 = vmatprep.subr.bf16.mxu1 %v3589_v36  ;;  %1846 = vmatprep.subr.bf16.mxu0 %v3591_v7  ;;  %v3686_v36 = vcombine.low %v880_v18, %v888_v19  ;;  %v3701_v7 = vcombine.high %v895_v26, %v903_v27  ;;  %v3703_v37 = vcombine.high %v896_v28, %v904_v29  ;;  %v873_v17 = vld [vmem:[#allocation6 + $0x2f0] sm:$0xff]  ;;  %v866_v18 = vld [vmem:[#allocation6 + $0x2b8] sm:$0xff] }
 0x650   :  { %v874_v19 = vld [vmem:[#allocation6 + $0x2f8] sm:$0xff] }
 0x651   :  { %1750 = vmatmul.mubr.bf16.vlgmr.msra.gmra.mrb[16].mxu1 %v4724_v5  ;;  %1793 = vmatmul.mubr.bf16.vlgmr.msra.gmra.mrb[20].mxu0 %v4724_v5 }
 0x652   :  { %1804 = vmatpush1.bf16.msra.mxu1 %v3588_v41  ;;  %1847 = vmatpush1.bf16.msra.mxu0 %v3590_v42  ;;  %v794_v41 = vld [vmem:[#allocation6 + $0x78] sm:$0xff]  ;;  %v3700_v42 = vcombine.low %v895_v26, %v903_v27  ;;  %v881_v26 = vld [vmem:[#allocation6 + $0x330] sm:$0xff] }
 0x653   :  { %1805 = vmatprep.subr.bf16.mxu1 %v3605_v43  ;;  %1848 = vmatprep.subr.bf16.mxu0 %v3607_v45  ;;  %v3702_v43 = vcombine.low %v896_v28, %v904_v29  ;;  %v3593_v45 = vcombine.high %v785_v38, %v793_v39  ;;  %v3595_v46 = vcombine.high %v786_v40, %v794_v41  ;;  %v889_v27 = vld [vmem:[#allocation6 + $0x370] sm:$0xff]  ;;  %v882_v28 = vld [vmem:[#allocation6 + $0x338] sm:$0xff] }
 0x654   :  { %1835 = vmatprep.mubr.bf16.mxu1 %v4479_v0  ;;  %1878 = vmatprep.mubr.bf16.mxu0 %v4479_v0  ;;  %v890_v29 = vld [vmem:[#allocation6 + $0x378] sm:$0xff] }
 0x656   :  { %1806 = vmatpush1.bf16.msra.mxu1 %v3604_v50  ;;  %1849 = vmatpush1.bf16.msra.mxu0 %v3606_v51  ;;  %v810_v50 = vld [vmem:[#allocation6 + $0xf8] sm:$0xff]  ;;  %v3592_v51 = vcombine.low %v785_v38, %v793_v39  ;;  %v897_v38 = vld [vmem:[#allocation6 + $0x3b0] sm:$0xff] }
 0x657   :  { %1807 = vmatprep.subr.bf16.mxu1 %v3621_v52  ;;  %1850 = vmatprep.subr.bf16.mxu0 %v3623_v53  ;;  %v3594_v52 = vcombine.low %v786_v40, %v794_v41  ;;  %v3609_v53 = vcombine.high %v801_v47, %v809_v48  ;;  %v3611_v54 = vcombine.high %v802_v49, %v810_v50  ;;  %v905_v39 = vld [vmem:[#allocation6 + $0x3f0] sm:$0xff]  ;;  %v898_v40 = vld [vmem:[#allocation6 + $0x3b8] sm:$0xff] }
 0x658   :  { %v906_v41 = vld [vmem:[#allocation6 + $0x3f8] sm:$0xff] }
 0x65a   :  { %1808 = vmatpush1.bf16.msra.mxu1 %v3620_v58  ;;  %1851 = vmatpush1.bf16.msra.mxu0 %v3622_v59  ;;  %v826_v58 = vld [vmem:[#allocation6 + $0x178] sm:$0xff]  ;;  %v3608_v59 = vcombine.low %v801_v47, %v809_v48  ;;  %v3704_v47 = vcombine.low %v897_v38, %v905_v39  ;;  %v3706_v48 = vcombine.low %v898_v40, %v906_v41 }
 0x65b   :  { %1809 = vmatprep.subr.bf16.mxu1 %v3637_v60  ;;  %1852 = vmatprep.subr.bf16.mxu0 %v3639_v61  ;;  %v3610_v60 = vcombine.low %v802_v49, %v810_v50  ;;  %v3625_v61 = vcombine.high %v817_v55, %v825_v56  ;;  %v3627_v62 = vcombine.high %v818_v57, %v826_v58  ;;  %v4233_v49 = vld [vmem:[#allocation8 + $0x40] sm:$0xff]  }
 0x65c   :  { %v4234_v50 = vld [vmem:[#allocation8 + $0xc0] sm:$0xff]  }
 0x65e   :  { %1810 = vmatpush1.bf16.msra.mxu1 %v3636_v2  ;;  %1853 = vmatpush1.bf16.msra.mxu0 %v3638_v3  ;;  %v842_v2 = vld [vmem:[#allocation6 + $0x1f8] sm:$0xff]  ;;  %v3624_v3 = vcombine.low %v817_v55, %v825_v56  ;;  %v4239_v55 = vld [vmem:[#allocation8 + $0x8] sm:$0xff]  }
 0x65f   :  { %1811 = vmatprep.subr.bf16.mxu1 %v3653_v4  ;;  %1854 = vmatprep.subr.bf16.mxu0 %v3655_v6  ;;  %v3626_v4 = vcombine.low %v818_v57, %v826_v58  ;;  %v3641_v6 = vcombine.high %v833_v63, %v841_v23  ;;  %v3643_v8 = vcombine.high %v834_v24, %v842_v2  ;;  %v4240_v56 = vld [vmem:[#allocation8 + $0x88] sm:$0xff]   ;;  %v4241_v57 = vld [vmem:[#allocation8 + $0x50] sm:$0xff]  }
 0x660   :  { %v4242_v58 = vld [vmem:[#allocation8 + $0xd0] sm:$0xff]  }
 0x662   :  { %1812 = vmatpush1.bf16.msra.mxu1 %v3652_v12  ;;  %1855 = vmatpush1.bf16.msra.mxu0 %v3654_v13  ;;  %v858_v12 = vld [vmem:[#allocation6 + $0x278] sm:$0xff]  ;;  %v3640_v13 = vcombine.low %v833_v63, %v841_v23  ;;  %v4249_v23 = vld [vmem:[#allocation8 + $0x60] sm:$0xff]  }
 0x663   :  { %1813 = vmatprep.subr.bf16.mxu1 %v3669_v14  ;;  %1856 = vmatprep.subr.bf16.mxu0 %v3671_v15  ;;  %v3642_v14 = vcombine.low %v834_v24, %v842_v2  ;;  %v3657_v15 = vcombine.high %v849_v9, %v857_v10  ;;  %v4247_v63 = vld [vmem:[#allocation8 + $0x18] sm:$0xff]   ;;  %v4250_v24 = vld [vmem:[#allocation8 + $0xe0] sm:$0xff]  }
 0x664   :  { %v4251_v2 = vld [vmem:[#allocation8 + $0x20] sm:$0xff]  }
 0x666   :  { %1814 = vmatpush1.bf16.msra.mxu1 %v3668_v20  ;;  %1857 = vmatpush1.bf16.msra.mxu0 %v3670_v21  ;;  %v3656_v20 = vcombine.low %v849_v9, %v857_v10  ;;  %v3658_v21 = vcombine.low %v850_v11, %v858_v12  ;;  %v4256_v9 = vld [vmem:[#allocation8 + $0xa8] sm:$0xff]   ;;  %v4257_v10 = vld [vmem:[#allocation8 + $0x70] sm:$0xff]  }
 0x667   :  { %1815 = vmatprep.subr.bf16.mxu1 %v3685_v22  ;;  %1858 = vmatprep.subr.bf16.mxu0 %v3687_v25  ;;  %v3673_v22 = vcombine.high %v865_v16, %v873_v17  ;;  %v3675_v25 = vcombine.high %v866_v18, %v874_v19 }
 0x66a   :  { %1816 = vmatpush1.bf16.msra.mxu1 %v3684_v35  ;;  %1859 = vmatpush1.bf16.msra.mxu0 %v3686_v36  ;;  %v3672_v35 = vcombine.low %v865_v16, %v873_v17  ;;  %v3674_v36 = vcombine.low %v866_v18, %v874_v19  ;;  %v4264_v16 = vld [vmem:[#allocation8 + $0xb8] sm:$0xff]   ;;  %v4265_v17 = vld [vmem:[#allocation8 + $0x140] sm:$0xff]  }
 0x66b   :  { %1817 = vmatprep.subr.bf16.mxu1 %v3701_v7  ;;  %1860 = vmatprep.subr.bf16.mxu0 %v3703_v37  ;;  %v3689_v7 = vcombine.high %v881_v26, %v889_v27  ;;  %v3691_v37 = vcombine.high %v882_v28, %v890_v29  ;;  %v4266_v18 = vld [vmem:[#allocation8 + $0x1c0] sm:$0xff]  }
 0x66c   :  { %v4743_v19 = vld [vmem:[%s4882_s8] sm:$0xff] }
 0x66e   :  { %1818 = vmatpush1.bf16.msra.mxu1 %v3700_v42  ;;  %1861 = vmatpush1.bf16.msra.mxu0 %v3702_v43  ;;  %v3688_v42 = vcombine.low %v881_v26, %v889_v27  ;;  %v3690_v43 = vcombine.low %v882_v28, %v890_v29 }
 0x66f   :  { %1889 = vmatprep.subr.bf16.mxu1 %v3593_v45  ;;  %1932 = vmatprep.subr.bf16.mxu0 %v3595_v46  ;;  %v3705_v45 = vcombine.high %v897_v38, %v905_v39  ;;  %v3707_v46 = vcombine.high %v898_v40, %v906_v41 }
 0x671   :  { %1836 = vmatmul.mubr.bf16.vlgmr.msra.gmra.mrb[20].mxu1 %v4724_v5  ;;  %1879 = vmatmul.mubr.bf16.vlgmr.msra.gmra.mrb[24].mxu0 %v4724_v5 }
 0x672   :  { %1890 = vmatpush1.bf16.msra.mxu1 %v3592_v51  ;;  %1933 = vmatpush1.bf16.msra.mxu0 %v3594_v52  ;;  %v4235_v51 = vld [vmem:[#allocation8] sm:$0xff]  }
 0x673   :  { %1891 = vmatprep.subr.bf16.mxu1 %v3609_v53  ;;  %1934 = vmatprep.subr.bf16.mxu0 %v3611_v54  ;;  %v4236_v52 = vld [vmem:[#allocation8 + $0x80] sm:$0xff]   ;;  %v4237_v53 = vld [vmem:[#allocation8 + $0x48] sm:$0xff]  }
 0x674   :  { %1921 = vmatprep.mubr.bf16.mxu1 %v4479_v0  ;;  %1964 = vmatprep.mubr.bf16.mxu0 %v4479_v0  ;;  %v3659_v0 = vcombine.high %v850_v11, %v858_v12  ;;  %v4238_v54 = vld [vmem:[#allocation8 + $0xc8] sm:$0xff]   ;;  %v4258_v11 = vld [vmem:[#allocation8 + $0xf0] sm:$0xff]  }
 0x675   :  { %v4259_v12 = vld [vmem:[#allocation8 + $0x30] sm:$0xff]  }
 0x676   :  { %1892 = vmatpush1.bf16.msra.mxu1 %v3608_v59  ;;  %1935 = vmatpush1.bf16.msra.mxu0 %v3610_v60  ;;  %v4243_v59 = vld [vmem:[#allocation8 + $0x10] sm:$0xff]  }
 0x677   :  { %1893 = vmatprep.subr.bf16.mxu1 %v3625_v61  ;;  %1936 = vmatprep.subr.bf16.mxu0 %v3627_v62  ;;  %v4244_v60 = vld [vmem:[#allocation8 + $0x90] sm:$0xff]   ;;  %v4245_v61 = vld [vmem:[#allocation8 + $0x58] sm:$0xff]  }
 0x678   :  { %v4246_v62 = vld [vmem:[#allocation8 + $0xd8] sm:$0xff]  }
 0x67a   :  { %1894 = vmatpush1.bf16.msra.mxu1 %v3624_v3  ;;  %1937 = vmatpush1.bf16.msra.mxu0 %v3626_v4  ;;  %v4252_v3 = vld [vmem:[#allocation8 + $0xa0] sm:$0xff]   ;;  %v4253_v4 = vld [vmem:[#allocation8 + $0x68] sm:$0xff]  }
 0x67b   :  { %1895 = vmatprep.subr.bf16.mxu1 %v3641_v6  ;;  %1938 = vmatprep.subr.bf16.mxu0 %v3643_v8  ;;  %v4254_v6 = vld [vmem:[#allocation8 + $0xe8] sm:$0xff]  }
 0x67c   :  { %v4255_v8 = vld [vmem:[#allocation8 + $0x28] sm:$0xff]  }
 0x67e   :  { %1896 = vmatpush1.bf16.msra.mxu1 %v3640_v13  ;;  %1939 = vmatpush1.bf16.msra.mxu0 %v3642_v14  ;;  %v4260_v13 = vld [vmem:[#allocation8 + $0xb0] sm:$0xff]   ;;  %v4261_v14 = vld [vmem:[#allocation8 + $0x78] sm:$0xff]  }
 0x67f   :  { %1897 = vmatprep.subr.bf16.mxu1 %v3657_v15  ;;  %1940 = vmatprep.subr.bf16.mxu0 %v3659_v0  ;;  %v4262_v15 = vld [vmem:[#allocation8 + $0xf8] sm:$0xff]  }
 0x680   :  { %v4263_v0 = vld [vmem:[#allocation8 + $0x38] sm:$0xff]  }
 0x682   :  { %1898 = vmatpush1.bf16.msra.mxu1 %v3656_v20  ;;  %1941 = vmatpush1.bf16.msra.mxu0 %v3658_v21  ;;  %v925_v20 = vsub.s32 3, %v4632_v30  ;;  %v914_v21 = vrot.slane %v4743_v19, %v4641_v33 }
 0x683   :  { %1899 = vmatprep.subr.bf16.mxu1 %v3673_v22  ;;  %1942 = vmatprep.subr.bf16.mxu0 %v3675_v25  ;;  %v922_v22 = vrot.slane %v4743_v19, %v4652_v44  ;;  %v918_v25 = vrot.slane %v4743_v19, %v4635_v31 }
 0x684   :  { %v926_v26 = vrot.slane %v4743_v19, %v925_v20 }
 0x686   :  { %1900 = vmatpush1.bf16.msra.mxu1 %v3672_v35  ;;  %1943 = vmatpush1.bf16.msra.mxu0 %v3674_v36 }
 0x687   :  { %1901 = vmatprep.subr.bf16.mxu1 %v3689_v7  ;;  %1944 = vmatprep.subr.bf16.mxu0 %v3691_v37 }
 0x68a   :  { %1902 = vmatpush1.bf16.msra.mxu1 %v3688_v42  ;;  %1945 = vmatpush1.bf16.msra.mxu0 %v3690_v43 }
 0x68b   :  { %1903 = vmatprep.subr.bf16.mxu1 %v3705_v45  ;;  %1946 = vmatprep.subr.bf16.mxu0 %v3707_v46 }
 0x68e   :  { %1904 = vmatpush1.bf16.msra.mxu1 %v3704_v47  ;;  %1947 = vmatpush1.bf16.msra.mxu0 %v3706_v48 }
 0x68f   :  { %3866 = vmatprep.subr.bf16.mxu1 %v4233_v49  ;;  %3888 = vmatprep.subr.bf16.mxu0 %v4234_v50 }
 0x691   :  { %1922 = vmatmul.mubr.bf16.vlgmr.msra.gmra.mrb[24].mxu1 %v4724_v5  ;;  %1965 = vmatmul.mubr.bf16.vlgmr.msra.gmra.mrb[28].mxu0 %v4724_v5  ;;  %v4248_v5 = vld [vmem:[#allocation8 + $0x98] sm:$0xff]  }
 0x692   :  { %3867 = vmatpush3.bf16.msra.mxu1 %v4235_v51  ;;  %3889 = vmatpush3.bf16.msra.mxu0 %v4236_v52 }
 0x693   :  { %3868 = vmatprep.subr.bf16.mxu1 %v4237_v53  ;;  %3890 = vmatprep.subr.bf16.mxu0 %v4238_v54 }
 0x696   :  { %3869 = vmatpush3.bf16.msra.mxu1 %v4239_v55  ;;  %3891 = vmatpush3.bf16.msra.mxu0 %v4240_v56 }
 0x697   :  { %3870 = vmatprep.subr.bf16.mxu1 %v4241_v57  ;;  %3892 = vmatprep.subr.bf16.mxu0 %v4242_v58 }
 0x69a   :  { %3871 = vmatpush3.bf16.msra.mxu1 %v4243_v59  ;;  %3893 = vmatpush3.bf16.msra.mxu0 %v4244_v60  ;;  %v4267_v60 = vld [vmem:[#allocation8 + $0x100] sm:$0xff]  }
 0x69b   :  { %3872 = vmatprep.subr.bf16.mxu1 %v4245_v61  ;;  %3894 = vmatprep.subr.bf16.mxu0 %v4246_v62  ;;  %v4268_v61 = vld [vmem:[#allocation8 + $0x180] sm:$0xff]   ;;  %v4269_v62 = vld [vmem:[#allocation8 + $0x148] sm:$0xff]  }
 0x69e   :  { %3873 = vmatpush3.bf16.msra.mxu1 %v4247_v63  ;;  %3895 = vmatpush3.bf16.msra.mxu0 %v4248_v5  ;;  %v4270_v63 = vld [vmem:[#allocation8 + $0x1c8] sm:$0xff]  }
 0x69f   :  { %3874 = vmatprep.subr.bf16.mxu1 %v4249_v23  ;;  %3896 = vmatprep.subr.bf16.mxu0 %v4250_v24  ;;  %v4271_v5 = vld [vmem:[#allocation8 + $0x108] sm:$0xff]   ;;  %v4273_v24 = vld [vmem:[#allocation8 + $0x150] sm:$0xff]  }
 0x6a0   :  { %v4272_v23 = vld [vmem:[#allocation8 + $0x188] sm:$0xff]  }
 0x6a2   :  { %3875 = vmatpush3.bf16.msra.mxu1 %v4251_v2  ;;  %3897 = vmatpush3.bf16.msra.mxu0 %v4252_v3  ;;  %v4274_v2 = vld [vmem:[#allocation8 + $0x1d0] sm:$0xff]  }
 0x6a3   :  { %3876 = vmatprep.subr.bf16.mxu1 %v4253_v4  ;;  %3898 = vmatprep.subr.bf16.mxu0 %v4254_v6  ;;  %v4275_v3 = vld [vmem:[#allocation8 + $0x110] sm:$0xff]   ;;  %v4277_v6 = vld [vmem:[#allocation8 + $0x158] sm:$0xff]  }
 0x6a4   :  { %v4276_v4 = vld [vmem:[#allocation8 + $0x190] sm:$0xff]  }
 0x6a6   :  { %3877 = vmatpush3.bf16.msra.mxu1 %v4255_v8  ;;  %3899 = vmatpush3.bf16.msra.mxu0 %v4256_v9  ;;  %v4278_v8 = vld [vmem:[#allocation8 + $0x1d8] sm:$0xff]  }
 0x6a7   :  { %3878 = vmatprep.subr.bf16.mxu1 %v4257_v10  ;;  %3900 = vmatprep.subr.bf16.mxu0 %v4258_v11  ;;  %v4279_v9 = vld [vmem:[#allocation8 + $0x118] sm:$0xff]   ;;  %v4281_v11 = vld [vmem:[#allocation8 + $0x160] sm:$0xff]  }
 0x6a8   :  { %v4280_v10 = vld [vmem:[#allocation8 + $0x198] sm:$0xff]  }
 0x6aa   :  { %3879 = vmatpush3.bf16.msra.mxu1 %v4259_v12  ;;  %3901 = vmatpush3.bf16.msra.mxu0 %v4260_v13  ;;  %v4282_v12 = vld [vmem:[#allocation8 + $0x1e0] sm:$0xff]  }
 0x6ab   :  { %3880 = vmatprep.subr.bf16.mxu1 %v4261_v14  ;;  %3902 = vmatprep.subr.bf16.mxu0 %v4262_v15  ;;  %v4283_v13 = vld [vmem:[#allocation8 + $0x120] sm:$0xff]   ;;  %v4285_v15 = vld [vmem:[#allocation8 + $0x168] sm:$0xff]  }
 0x6ac   :  { %v4284_v14 = vld [vmem:[#allocation8 + $0x1a0] sm:$0xff]  }
 0x6ae   :  { %3881 = vmatpush3.bf16.msra.mxu1 %v4263_v0  ;;  %3903 = vmatpush3.bf16.msra.mxu0 %v4264_v16  ;;  %v4286_v0 = vld [vmem:[#allocation8 + $0x1e8] sm:$0xff]   ;;  %v929_v16 = vsub.s32 4, %v4632_v30 }
 0x6af   :  { %3910 = vmatprep.subr.bf16.mxu1 %v4265_v17  ;;  %3932 = vmatprep.subr.bf16.mxu0 %v4266_v18  ;;  %v937_v17 = vsub.s32 6, %v4632_v30  ;;  %v933_v18 = vsub.s32 5, %v4632_v30 }
 0x704   :  { %v1665_v27 = vpop.f32.mrb[12].mxu1  ;;  %v1708_v28 = vpop.f32.mrb[16].mxu0 }
 0x705   :  { %v1666_v29 = vadd.f32 %v1665_v27, %v914_v21  ;;  %v1709_v35 = vadd.f32 %v1708_v28, %v922_v22  ;;  %v1667_v36 = vpop.f32.mrb[13].mxu1  ;;  %v1710_v7 = vpop.f32.mrb[17].mxu0  ;;  %v938_v27 = vrot.slane %v4743_v19, %v937_v17  ;;  %v4289_v28 = vld [vmem:[#allocation8 + $0x170] sm:$0xff]  }
 0x706   :  { %v1668_v37 = vadd.f32 %v1667_v36, %v918_v25  ;;  %v1711_v38 = vadd.f32 %v1710_v7, %v926_v26  ;;  %v1669_v39 = vpop.f32.mrb[14].mxu1  ;;  %v1712_v40 = vpop.f32.mrb[18].mxu0 }
 0x707   :  { %v1670_v41 = vadd.f32 %v1669_v39, %v914_v21  ;;  %v1713_v42 = vadd.f32 %v1712_v40, %v922_v22  ;;  %v1671_v43 = vpop.f32.mrb[15].mxu1  ;;  %v1714_v45 = vpop.f32.mrb[19].mxu0  ;;  %v1975_v48 = vmax.f32 %v1666_v29, 0.0  ;;  %v1977_v49 = vmax.f32 %v1709_v35, 0.0  ;;  %v4287_v22 = vld [vmem:[#allocation8 + $0x128] sm:$0xff]   ;;  %v4290_v29 = vld [vmem:[#allocation8 + $0x1f0] sm:$0xff]  }
 0x708   :  { %v1672_v46 = vadd.f32 %v1671_v43, %v918_v25  ;;  %v1715_v47 = vadd.f32 %v1714_v45, %v926_v26  ;;  %v1976_v52 = vmax.f32 %v1668_v37, 0.0  ;;  %v1978_v53 = vmax.f32 %v1711_v38, 0.0  ;;  %v4288_v25 = vld [vmem:[#allocation8 + $0x1a8] sm:$0xff]   ;;  %v4291_v38 = vld [vmem:[#allocation8 + $0x130] sm:$0xff]   ;;  %v4293_v45 = vld [vmem:[#allocation8 + $0x178] sm:$0xff]  }
 0x709   :  { %v1991_v50 = vmax.f32 %v1670_v41, 0.0  ;;  %v1993_v51 = vmax.f32 %v1713_v42, 0.0  ;;  %v941_v21 = vsub.s32 7, %v4632_v30  ;;  %v930_v26 = vrot.slane %v4743_v19, %v929_v16  ;;  %v4292_v39 = vld [vmem:[#allocation8 + $0x1b0] sm:$0xff]  }
 0x70a   :  { %v1992_v54 = vmax.f32 %v1672_v46, 0.0  ;;  %v1994_v55 = vmax.f32 %v1715_v47, 0.0  ;;  %v934_v35 = vrot.slane %v4743_v19, %v933_v18  ;;  %v4294_v46 = vld [vmem:[#allocation8 + $0x1f8] sm:$0xff]  }
 0x70b   :  { %v2007_v56 = vpack.c.bf16 %v1991_v50, %v1975_v48  ;;  %v2009_v57 = vpack.c.bf16 %v1993_v51, %v1977_v49  ;;  %v942_v36 = vrot.slane %v4743_v19, %v941_v21 }
 0x70c   :  { %v2008_v58 = vpack.c.bf16 %v1992_v54, %v1976_v52  ;;  %v2010_v59 = vpack.c.bf16 %v1994_v55, %v1978_v53 }
 0x70e   :  { %3086 = vmatprep.mubr.bf16.mxu1 %v2008_v58  ;;  %3127 = vmatprep.mubr.bf16.mxu0 %v2010_v59 }
 0x70f   :  { %3087 = vmatmul.mubr.bf16.vlgmr.msra.gmra.mrb[28].mxu1 %v2007_v56  ;;  %3128 = vmatmul.mubr.bf16.vlgmr.msra.gmra.mrb[32].mxu0 %v2009_v57  ;;  %v4295_v56 = vld [vmem:[#allocation8 + $0x138] sm:$0xff]  }
 0x710   :  { %3911 = vmatpush3.bf16.msra.mxu1 %v4267_v60  ;;  %3933 = vmatpush3.bf16.msra.mxu0 %v4268_v61  ;;  %v4296_v57 = vld [vmem:[#allocation8 + $0x1b8] sm:$0xff]  }
 0x711   :  { %3912 = vmatprep.subr.bf16.mxu1 %v4269_v62  ;;  %3934 = vmatprep.subr.bf16.mxu0 %v4270_v63  ;;  %v4297_v62 = vld [vmem:[#allocation8 + $0x240] sm:$0xff]  }
 0x712   :  { %v4298_v63 = vld [vmem:[#allocation8 + $0x2c0] sm:$0xff]  }
 0x714   :  { %3913 = vmatpush3.bf16.msra.mxu1 %v4271_v5  ;;  %3935 = vmatpush3.bf16.msra.mxu0 %v4272_v23 }
 0x715   :  { %3914 = vmatprep.subr.bf16.mxu1 %v4273_v24  ;;  %3936 = vmatprep.subr.bf16.mxu0 %v4274_v2 }
 0x718   :  { %3915 = vmatpush3.bf16.msra.mxu1 %v4275_v3  ;;  %3937 = vmatpush3.bf16.msra.mxu0 %v4276_v4 }
 0x719   :  { %3916 = vmatprep.subr.bf16.mxu1 %v4277_v6  ;;  %3938 = vmatprep.subr.bf16.mxu0 %v4278_v8 }
 0x71c   :  { %3917 = vmatpush3.bf16.msra.mxu1 %v4279_v9  ;;  %3939 = vmatpush3.bf16.msra.mxu0 %v4280_v10  ;;  %v4299_v9 = vld [vmem:[#allocation8 + $0x200] sm:$0xff]  }
 0x71d   :  { %3918 = vmatprep.subr.bf16.mxu1 %v4281_v11  ;;  %3940 = vmatprep.subr.bf16.mxu0 %v4282_v12  ;;  %v4300_v10 = vld [vmem:[#allocation8 + $0x280] sm:$0xff]   ;;  %v4301_v11 = vld [vmem:[#allocation8 + $0x248] sm:$0xff]  }
 0x71e   :  { %v4302_v12 = vld [vmem:[#allocation8 + $0x2c8] sm:$0xff]  }
 0x720   :  { %3919 = vmatpush3.bf16.msra.mxu1 %v4283_v13  ;;  %3941 = vmatpush3.bf16.msra.mxu0 %v4284_v14  ;;  %v4303_v13 = vld [vmem:[#allocation8 + $0x208] sm:$0xff]  }
 0x721   :  { %3920 = vmatprep.subr.bf16.mxu1 %v4285_v15  ;;  %3942 = vmatprep.subr.bf16.mxu0 %v4286_v0  ;;  %v4304_v14 = vld [vmem:[#allocation8 + $0x288] sm:$0xff]   ;;  %v4305_v15 = vld [vmem:[#allocation8 + $0x250] sm:$0xff]  }
 0x722   :  { %v4306_v0 = vld [vmem:[#allocation8 + $0x2d0] sm:$0xff]  }
 0x724   :  { %v1751_v7 = vpop.f32.mrb[16].mxu1  ;;  %v1794_v37 = vpop.f32.mrb[20].mxu0  ;;  %3921 = vmatpush3.bf16.msra.mxu1 %v4287_v22  ;;  %3943 = vmatpush3.bf16.msra.mxu0 %v4288_v25  ;;  %v4307_v22 = vld [vmem:[#allocation8 + $0x210] sm:$0xff]  }
 0x725   :  { %v1752_v40 = vadd.f32 %v1751_v7, %v930_v26  ;;  %v1795_v41 = vadd.f32 %v1794_v37, %v938_v27  ;;  %v1753_v42 = vpop.f32.mrb[17].mxu1  ;;  %v1796_v43 = vpop.f32.mrb[21].mxu0  ;;  %3922 = vmatprep.subr.bf16.mxu1 %v4289_v28  ;;  %3944 = vmatprep.subr.bf16.mxu0 %v4290_v29  ;;  %v4308_v25 = vld [vmem:[#allocation8 + $0x290] sm:$0xff]   ;;  %v4311_v28 = vld [vmem:[#allocation8 + $0x218] sm:$0xff]   ;;  %v4315_v7 = vld [vmem:[#allocation8 + $0x220] sm:$0xff]  }
 0x726   :  { %v1754_v47 = vadd.f32 %v1753_v42, %v934_v35  ;;  %v1797_v48 = vadd.f32 %v1796_v43, %v942_v36  ;;  %v1755_v49 = vpop.f32.mrb[18].mxu1  ;;  %v1798_v50 = vpop.f32.mrb[22].mxu0  ;;  %v4312_v29 = vld [vmem:[#allocation8 + $0x298] sm:$0xff]   ;;  %v4316_v37 = vld [vmem:[#allocation8 + $0x2a0] sm:$0xff]   ;;  %v4320_v42 = vld [vmem:[#allocation8 + $0x2a8] sm:$0xff]  }
 0x727   :  { %v1756_v51 = vadd.f32 %v1755_v49, %v930_v26  ;;  %v1799_v19 = vadd.f32 %v1798_v50, %v938_v27  ;;  %v1757_v52 = vpop.f32.mrb[19].mxu1  ;;  %v1800_v53 = vpop.f32.mrb[23].mxu0  ;;  %v1979_v58 = vmax.f32 %v1752_v40, 0.0  ;;  %v1981_v59 = vmax.f32 %v1795_v41, 0.0  ;;  %v4309_v26 = vld [vmem:[#allocation8 + $0x258] sm:$0xff]   ;;  %v4774_v40 = vld [vmem:[%s4882_s8 + $0x8] sm:$0xff] }
 0x728   :  { %v1758_v54 = vadd.f32 %v1757_v52, %v934_v35  ;;  %v1801_v55 = vadd.f32 %v1800_v53, %v942_v36  ;;  %3923 = vmatpush3.bf16.msra.mxu1 %v4291_v38  ;;  %3945 = vmatpush3.bf16.msra.mxu0 %v4292_v39  ;;  %v1980_v5 = vmax.f32 %v1754_v47, 0.0  ;;  %v1982_v23 = vmax.f32 %v1797_v48, 0.0  ;;  %v4310_v27 = vld [vmem:[#allocation8 + $0x2d8] sm:$0xff]   ;;  %v4313_v35 = vld [vmem:[#allocation8 + $0x260] sm:$0xff]   ;;  %v4317_v38 = vld [vmem:[#allocation8 + $0x268] sm:$0xff]  }
 0x729   :  { %v1995_v60 = vmax.f32 %v1756_v51, 0.0  ;;  %v1997_v61 = vmax.f32 %v1799_v19, 0.0  ;;  %3924 = vmatprep.subr.bf16.mxu1 %v4293_v45  ;;  %3946 = vmatprep.subr.bf16.mxu0 %v4294_v46  ;;  %v4314_v36 = vld [vmem:[#allocation8 + $0x2e0] sm:$0xff]   ;;  %v4318_v39 = vld [vmem:[#allocation8 + $0x2e8] sm:$0xff]   ;;  %v946_v43 = vrot.slane %v4774_v40, %v4641_v33  ;;  %v954_v45 = vrot.slane %v4774_v40, %v4652_v44  ;;  %v4321_v46 = vld [vmem:[#allocation8 + $0x270] sm:$0xff]  }
 0x72a   :  { %v1996_v24 = vmax.f32 %v1758_v54, 0.0  ;;  %v1998_v2 = vmax.f32 %v1801_v55, 0.0  ;;  %v4319_v41 = vld [vmem:[#allocation8 + $0x228] sm:$0xff]   ;;  %v4322_v47 = vld [vmem:[#allocation8 + $0x2f0] sm:$0xff]   ;;  %v950_v48 = vrot.slane %v4774_v40, %v4635_v31  ;;  %v958_v49 = vrot.slane %v4774_v40, %v925_v20  ;;  %v4325_v44 = vld [vmem:[#allocation8 + $0x278] sm:$0xff]  }
 0x72b   :  { %v2011_v3 = vpack.c.bf16 %v1995_v60, %v1979_v58  ;;  %v2013_v4 = vpack.c.bf16 %v1997_v61, %v1981_v59  ;;  %v4323_v19 = vld [vmem:[#allocation8 + $0x230] sm:$0xff]  }
 0x72c   :  { %v2012_v6 = vpack.c.bf16 %v1996_v24, %v1980_v5  ;;  %v2014_v8 = vpack.c.bf16 %v1998_v2, %v1982_v23  ;;  %3925 = vmatpush3.bf16.msra.mxu1 %v4295_v56  ;;  %3947 = vmatpush3.bf16.msra.mxu0 %v4296_v57  ;;  %v4324_v52 = vld [vmem:[#allocation8 + $0x2b0] sm:$0xff]   ;;  %v4326_v56 = vld [vmem:[#allocation8 + $0x2f8] sm:$0xff]  }
 0x72d   :  { %3954 = vmatprep.subr.bf16.mxu1 %v4297_v62  ;;  %3976 = vmatprep.subr.bf16.mxu0 %v4298_v63  ;;  %v4327_v23 = vld [vmem:[#allocation8 + $0x238] sm:$0xff]  }
 0x72e   :  { %3168 = vmatprep.mubr.bf16.mxu1 %v2012_v6  ;;  %3209 = vmatprep.mubr.bf16.mxu0 %v2014_v8  ;;  %v4328_v24 = vld [vmem:[#allocation8 + $0x2b8] sm:$0xff]   ;;  %v4329_v8 = vld [vmem:[#allocation8 + $0x340] sm:$0xff]  }
 0x72f   :  { %3169 = vmatmul.mubr.bf16.vlgmr.msra.gmra.mrb[32].mxu1 %v2011_v3  ;;  %3210 = vmatmul.mubr.bf16.vlgmr.msra.gmra.mrb[36].mxu0 %v2013_v4 }
 0x730   :  { %3955 = vmatpush3.bf16.msra.mxu1 %v4299_v9  ;;  %3977 = vmatpush3.bf16.msra.mxu0 %v4300_v10  ;;  %v4330_v9 = vld [vmem:[#allocation8 + $0x3c0] sm:$0xff]  }
 0x731   :  { %3956 = vmatprep.subr.bf16.mxu1 %v4301_v11  ;;  %3978 = vmatprep.subr.bf16.mxu0 %v4302_v12 }
 0x734   :  { %3957 = vmatpush3.bf16.msra.mxu1 %v4303_v13  ;;  %3979 = vmatpush3.bf16.msra.mxu0 %v4304_v14 }
 0x735   :  { %3958 = vmatprep.subr.bf16.mxu1 %v4305_v15  ;;  %3980 = vmatprep.subr.bf16.mxu0 %v4306_v0 }
 0x738   :  { %3959 = vmatpush3.bf16.msra.mxu1 %v4307_v22  ;;  %3981 = vmatpush3.bf16.msra.mxu0 %v4308_v25  ;;  %v4331_v25 = vld [vmem:[#allocation8 + $0x300] sm:$0xff]  }
 0x739   :  { %3960 = vmatprep.subr.bf16.mxu1 %v4309_v26  ;;  %3982 = vmatprep.subr.bf16.mxu0 %v4310_v27  ;;  %v4332_v26 = vld [vmem:[#allocation8 + $0x380] sm:$0xff]   ;;  %v4333_v27 = vld [vmem:[#allocation8 + $0x348] sm:$0xff]  }
 0x73c   :  { %3961 = vmatpush3.bf16.msra.mxu1 %v4311_v28  ;;  %3983 = vmatpush3.bf16.msra.mxu0 %v4312_v29  ;;  %v4334_v28 = vld [vmem:[#allocation8 + $0x3c8] sm:$0xff]  }
 0x73d   :  { %3962 = vmatprep.subr.bf16.mxu1 %v4313_v35  ;;  %3984 = vmatprep.subr.bf16.mxu0 %v4314_v36  ;;  %v4335_v29 = vld [vmem:[#allocation8 + $0x308] sm:$0xff]   ;;  %v4337_v36 = vld [vmem:[#allocation8 + $0x350] sm:$0xff]  }
 0x73e   :  { %v4336_v35 = vld [vmem:[#allocation8 + $0x388] sm:$0xff]  }
 0x740   :  { %3963 = vmatpush3.bf16.msra.mxu1 %v4315_v7  ;;  %3985 = vmatpush3.bf16.msra.mxu0 %v4316_v37  ;;  %v4338_v7 = vld [vmem:[#allocation8 + $0x3d0] sm:$0xff]  }
 0x741   :  { %3964 = vmatprep.subr.bf16.mxu1 %v4317_v38  ;;  %3986 = vmatprep.subr.bf16.mxu0 %v4318_v39  ;;  %v4339_v37 = vld [vmem:[#allocation8 + $0x310] sm:$0xff]   ;;  %v4341_v39 = vld [vmem:[#allocation8 + $0x358] sm:$0xff]  }
 0x742   :  { %v4340_v38 = vld [vmem:[#allocation8 + $0x390] sm:$0xff]  }
 0x744   :  { %v1837_v50 = vpop.f32.mrb[20].mxu1  ;;  %v1880_v51 = vpop.f32.mrb[24].mxu0  ;;  %3965 = vmatpush3.bf16.msra.mxu1 %v4319_v41  ;;  %3987 = vmatpush3.bf16.msra.mxu0 %v4320_v42  ;;  %v4342_v41 = vld [vmem:[#allocation8 + $0x3d8] sm:$0xff]  }
 0x745   :  { %v1838_v53 = vadd.f32 %v1837_v50, %v946_v43  ;;  %v1881_v33 = vadd.f32 %v1880_v51, %v954_v45  ;;  %v1839_v54 = vpop.f32.mrb[21].mxu1  ;;  %v1882_v55 = vpop.f32.mrb[25].mxu0  ;;  %3966 = vmatprep.subr.bf16.mxu1 %v4321_v46  ;;  %3988 = vmatprep.subr.bf16.mxu0 %v4322_v47  ;;  %v4343_v42 = vld [vmem:[#allocation8 + $0x318] sm:$0xff]   ;;  %v4346_v46 = vld [vmem:[#allocation8 + $0x3e0] sm:$0xff]   ;;  %v4350_v50 = vld [vmem:[#allocation8 + $0x3e8] sm:$0xff]  }
 0x746   :  { %v1840_v57 = vadd.f32 %v1839_v54, %v950_v48  ;;  %v1883_v31 = vadd.f32 %v1882_v55, %v958_v49  ;;  %v1841_v58 = vpop.f32.mrb[22].mxu1  ;;  %v1884_v59 = vpop.f32.mrb[26].mxu0  ;;  %v4347_v47 = vld [vmem:[#allocation8 + $0x320] sm:$0xff]   ;;  %v4351_v51 = vld [vmem:[#allocation8 + $0x328] sm:$0xff]   ;;  %v4354_v54 = vld [vmem:[#allocation8 + $0x3f0] sm:$0xff]   ;;  %v966_v55 = vrot.slane %v4774_v40, %v933_v18 }
 0x747   :  { %v1842_v60 = vadd.f32 %v1841_v58, %v946_v43  ;;  %v1885_v20 = vadd.f32 %v1884_v59, %v954_v45  ;;  %v1843_v61 = vpop.f32.mrb[23].mxu1  ;;  %v1886_v62 = vpop.f32.mrb[27].mxu0  ;;  %v1983_v2 = vmax.f32 %v1838_v53, 0.0  ;;  %v1985_v3 = vmax.f32 %v1881_v33, 0.0  ;;  %v4344_v43 = vld [vmem:[#allocation8 + $0x398] sm:$0xff]   ;;  %v4345_v45 = vld [vmem:[#allocation8 + $0x360] sm:$0xff]  }
 0x748   :  { %v1844_v63 = vadd.f32 %v1843_v61, %v950_v48  ;;  %v1887_v5 = vadd.f32 %v1886_v62, %v958_v49  ;;  %3967 = vmatpush3.bf16.msra.mxu1 %v4323_v19  ;;  %3989 = vmatpush3.bf16.msra.mxu0 %v4324_v52  ;;  %v1984_v10 = vmax.f32 %v1840_v57, 0.0  ;;  %v1986_v11 = vmax.f32 %v1883_v31, 0.0  ;;  %v4348_v48 = vld [vmem:[#allocation8 + $0x3a0] sm:$0xff]   ;;  %v4349_v49 = vld [vmem:[#allocation8 + $0x368] sm:$0xff]   ;;  %v4353_v33 = vld [vmem:[#allocation8 + $0x370] sm:$0xff]  }
 0x749   :  { %v1999_v4 = vmax.f32 %v1842_v60, 0.0  ;;  %v2001_v6 = vmax.f32 %v1885_v20, 0.0  ;;  %3968 = vmatprep.subr.bf16.mxu1 %v4325_v44  ;;  %3990 = vmatprep.subr.bf16.mxu0 %v4326_v56  ;;  %v4352_v19 = vld [vmem:[#allocation8 + $0x3a8] sm:$0xff]   ;;  %v962_v52 = vrot.slane %v4774_v40, %v929_v16  ;;  %v970_v53 = vrot.slane %v4774_v40, %v937_v17  ;;  %v4355_v31 = vld [vmem:[#allocation8 + $0x330] sm:$0xff]   ;;  %v4357_v20 = vld [vmem:[#allocation8 + $0x378] sm:$0xff]  }
 0x74a   :  { %v2000_v12 = vmax.f32 %v1844_v63, 0.0  ;;  %v2002_v13 = vmax.f32 %v1887_v5, 0.0  ;;  %v974_v44 = vrot.slane %v4774_v40, %v941_v21  ;;  %v4356_v16 = vld [vmem:[#allocation8 + $0x3b0] sm:$0xff]   ;;  %v4358_v61 = vld [vmem:[#allocation8 + $0x3f8] sm:$0xff]  }
 0x74b   :  { %v2015_v14 = vpack.c.bf16 %v1999_v4, %v1983_v2  ;;  %v2017_v15 = vpack.c.bf16 %v2001_v6, %v1985_v3  ;;  %v4359_v3 = vld [vmem:[#allocation8 + $0x338] sm:$0xff]  }
 0x74c   :  { %v2016_v0 = vpack.c.bf16 %v2000_v12, %v1984_v10  ;;  %v2018_v22 = vpack.c.bf16 %v2002_v13, %v1986_v11  ;;  %3969 = vmatpush3.bf16.msra.mxu1 %v4327_v23  ;;  %3991 = vmatpush3.bf16.msra.mxu0 %v4328_v24  ;;  %v4360_v4 = vld [vmem:[#allocation8 + $0x3b8] sm:$0xff]  }
 0x74d   :  { %3998 = vmatprep.subr.bf16.mxu1 %v4329_v8  ;;  %4020 = vmatprep.subr.bf16.mxu0 %v4330_v9 }
 0x74e   :  { %3250 = vmatprep.mubr.bf16.mxu1 %v2016_v0  ;;  %3291 = vmatprep.mubr.bf16.mxu0 %v2018_v22 }
 0x74f   :  { %3251 = vmatmul.mubr.bf16.vlgmr.msra.gmra.mrb[36].mxu1 %v2015_v14  ;;  %3292 = vmatmul.mubr.bf16.vlgmr.msra.gmra.mrb[40].mxu0 %v2017_v15 }
 0x750   :  { %3999 = vmatpush3.bf16.msra.mxu1 %v4331_v25  ;;  %4021 = vmatpush3.bf16.msra.mxu0 %v4332_v26 }
 0x751   :  { %4000 = vmatprep.subr.bf16.mxu1 %v4333_v27  ;;  %4022 = vmatprep.subr.bf16.mxu0 %v4334_v28  ;;  %v3708_v28 = vld [vmem:[%s4884_s10] ss:$0 sm:$0xff] }
 0x754   :  { %4001 = vmatpush3.bf16.msra.mxu1 %v4335_v29  ;;  %4023 = vmatpush3.bf16.msra.mxu0 %v4336_v35 }
 0x755   :  { %4002 = vmatprep.subr.bf16.mxu1 %v4337_v36  ;;  %4024 = vmatprep.subr.bf16.mxu0 %v4338_v7 }
 0x758   :  { %4003 = vmatpush3.bf16.msra.mxu1 %v4339_v37  ;;  %4025 = vmatpush3.bf16.msra.mxu0 %v4340_v38 }
 0x759   :  { %4004 = vmatprep.subr.bf16.mxu1 %v4341_v39  ;;  %4026 = vmatprep.subr.bf16.mxu0 %v4342_v41 }
 0x75c   :  { %4005 = vmatpush3.bf16.msra.mxu1 %v4343_v42  ;;  %4027 = vmatpush3.bf16.msra.mxu0 %v4344_v43 }
 0x75d   :  { %4006 = vmatprep.subr.bf16.mxu1 %v4345_v45  ;;  %4028 = vmatprep.subr.bf16.mxu0 %v4346_v46 }
 0x760   :  { %4007 = vmatpush3.bf16.msra.mxu1 %v4347_v47  ;;  %4029 = vmatpush3.bf16.msra.mxu0 %v4348_v48 }
 0x761   :  { %4008 = vmatprep.subr.bf16.mxu1 %v4349_v49  ;;  %4030 = vmatprep.subr.bf16.mxu0 %v4350_v50 }
 0x764   :  { %v1923_v56 = vpop.f32.mrb[24].mxu1  ;;  %v1966_v57 = vpop.f32.mrb[28].mxu0  ;;  %4009 = vmatpush3.bf16.msra.mxu1 %v4351_v51  ;;  %4031 = vmatpush3.bf16.msra.mxu0 %v4352_v19 }
 0x765   :  { %v1924_v58 = vadd.f32 %v1923_v56, %v962_v52  ;;  %v1967_v59 = vadd.f32 %v1966_v57, %v970_v53  ;;  %v1925_v60 = vpop.f32.mrb[25].mxu1  ;;  %v1968_v17 = vpop.f32.mrb[29].mxu0  ;;  %4010 = vmatprep.subr.bf16.mxu1 %v4353_v33  ;;  %4032 = vmatprep.subr.bf16.mxu0 %v4354_v54 }
 0x766   :  { %v1926_v62 = vadd.f32 %v1925_v60, %v966_v55  ;;  %v1969_v18 = vadd.f32 %v1968_v17, %v974_v44  ;;  %v1927_v63 = vpop.f32.mrb[26].mxu1  ;;  %v1970_v30 = vpop.f32.mrb[30].mxu0 }
 0x767   :  { %v1928_v5 = vadd.f32 %v1927_v63, %v962_v52  ;;  %v1971_v21 = vadd.f32 %v1970_v30, %v970_v53  ;;  %v1929_v40 = vpop.f32.mrb[27].mxu1  ;;  %v1972_v23 = vpop.f32.mrb[31].mxu0  ;;  %v1987_v6 = vmax.f32 %v1924_v58, 0.0  ;;  %v1989_v8 = vmax.f32 %v1967_v59, 0.0 }
 0x768   :  { %v1930_v24 = vadd.f32 %v1929_v40, %v966_v55  ;;  %v1973_v2 = vadd.f32 %v1972_v23, %v974_v44  ;;  %4011 = vmatpush3.bf16.msra.mxu1 %v4355_v31  ;;  %4033 = vmatpush3.bf16.msra.mxu0 %v4356_v16  ;;  %v1988_v11 = vmax.f32 %v1926_v62, 0.0  ;;  %v1990_v12 = vmax.f32 %v1969_v18, 0.0 }
 0x769   :  { %v2003_v9 = vmax.f32 %v1928_v5, 0.0  ;;  %v2005_v10 = vmax.f32 %v1971_v21, 0.0  ;;  %4012 = vmatprep.subr.bf16.mxu1 %v4357_v20  ;;  %4034 = vmatprep.subr.bf16.mxu0 %v4358_v61 }
 0x76a   :  { %v2004_v13 = vmax.f32 %v1930_v24, 0.0  ;;  %v2006_v14 = vmax.f32 %v1973_v2, 0.0 }
 0x76b   :  { %v2019_v15 = vpack.c.bf16 %v2003_v9, %v1987_v6  ;;  %v2021_v0 = vpack.c.bf16 %v2005_v10, %v1989_v8 }
 0x76c   :  { %v2020_v22 = vpack.c.bf16 %v2004_v13, %v1988_v11  ;;  %v2022_v25 = vpack.c.bf16 %v2006_v14, %v1990_v12  ;;  %4013 = vmatpush3.bf16.msra.mxu1 %v4359_v3  ;;  %4035 = vmatpush3.bf16.msra.mxu0 %v4360_v4 }
 0x76e   :  { %3332 = vmatprep.mubr.bf16.mxu1 %v2020_v22  ;;  %3373 = vmatprep.mubr.bf16.mxu0 %v2022_v25 }
 0x76f   :  { %3333 = vmatmul.mubr.bf16.vlgmr.msra.gmra.mrb[40].mxu1 %v2019_v15  ;;  %3374 = vmatmul.mubr.bf16.vlgmr.msra.gmra.mrb[44].mxu0 %v2021_v0 }
 0x770   :  { %4153 = vmatprep.mubr.msk.f32.mxu1 %vm4481_vm0, %v4480_v1 }
 0x7e2   :  { %v3882_v26 = vpop.f32.mrb[28].mxu1  ;;  %v3904_v27 = vpop.f32.mrb[32].mxu0 }
 0x7e3   :  { %v3883_v29 = vpop.f32.mrb[29].mxu1  ;;  %v3905_v35 = vpop.f32.mrb[33].mxu0 }
 0x7e4   :  { %v3884_v36 = vadd.f32 %v3883_v29, %v3882_v26  ;;  %v3906_v7 = vadd.f32 %v3905_v35, %v3904_v27  ;;  %v3885_v37 = vpop.f32.mrb[30].mxu1  ;;  %v3907_v38 = vpop.f32.mrb[34].mxu0 }
 0x7e5   :  { %v3886_v39 = vpop.f32.mrb[31].mxu1  ;;  %v3908_v41 = vpop.f32.mrb[35].mxu0 }
 0x7e6   :  { %v3089_v42 = vadd.f32 %v3884_v36, %v3708_v28  ;;  %v3887_v43 = vadd.f32 %v3886_v39, %v3885_v37  ;;  %v3909_v45 = vadd.f32 %v3908_v41, %v3907_v38  ;;  %v3433_v36 = vld [vmem:[%s4887_s13] sm:$0xff]  ;;  %v4482_v37 = vmov 0.0|0.0  }
 0x7e7   :  { %4156 = vmatprep.subr.bf16.mxu1 %v4482_v37 }
 0x7e8   :  { %v3130_v46 = vadd.f32 %v3906_v7, %v3089_v42  ;;  %v3092_v47 = vadd.f32 %v3887_v43, %v3708_v28  ;;  %v3434_v7 = vld [vmem:[%s4887_s13 + $0x8] sm:$0xff] }
 0x7e9   :  { %v4157_v38 = vpack.c.bf16 %v3434_v7, %v3433_v36 }
 0x7ea   :  { %v3133_v1 = vadd.f32 %v3909_v45, %v3092_v47  ;;  %v3435_v47 = vld [vmem:[%s4887_s13 + $0x10] sm:$0xff] }
 0x7eb   :  { %4158 = vmatpush3.bf16.msra.mxu1 %v4157_v38 }
 0x7ec   :  { %4159 = vmatprep.subr.bf16.mxu1 %v4482_v37 }
 0x802   :  { %v3926_v48 = vpop.f32.mrb[32].mxu1  ;;  %v3948_v49 = vpop.f32.mrb[36].mxu0 }
 0x803   :  { %v3927_v50 = vpop.f32.mrb[33].mxu1  ;;  %v3949_v51 = vpop.f32.mrb[37].mxu0 }
 0x804   :  { %v3928_v19 = vadd.f32 %v3927_v50, %v3926_v48  ;;  %v3950_v52 = vadd.f32 %v3949_v51, %v3948_v49  ;;  %v3929_v53 = vpop.f32.mrb[34].mxu1  ;;  %v3951_v33 = vpop.f32.mrb[38].mxu0  ;;  %v3437_v49 = vld [vmem:[%s4887_s13 + $0x20] sm:$0xff]  ;;  %v3438_v50 = vld [vmem:[%s4887_s13 + $0x28] sm:$0xff] }
 0x805   :  { %v3930_v54 = vpop.f32.mrb[35].mxu1  ;;  %v3952_v55 = vpop.f32.mrb[39].mxu0  ;;  %v4163_v51 = vpack.c.bf16 %v3438_v50, %v3437_v49 }
 0x806   :  { %v3171_v44 = vadd.f32 %v3928_v19, %v3130_v46  ;;  %v3931_v56 = vadd.f32 %v3930_v54, %v3929_v53  ;;  %v3953_v57 = vadd.f32 %v3952_v55, %v3951_v33  ;;  %v3439_v19 = vld [vmem:[%s4887_s13 + $0x30] sm:$0xff]  ;;  %v3441_v33 = vld [vmem:[%s4887_s13 + $0x40] sm:$0xff]  ;;  %v3442_v54 = vld [vmem:[%s4887_s13 + $0x48] sm:$0xff] }
 0x807   :  { %v4169_v55 = vpack.c.bf16 %v3442_v54, %v3441_v33 }
 0x808   :  { %v3212_v31 = vadd.f32 %v3950_v52, %v3171_v44  ;;  %v3174_v16 = vadd.f32 %v3931_v56, %v3133_v1  ;;  %v3436_v1 = vld [vmem:[%s4887_s13 + $0x18] sm:$0xff]  ;;  %v3443_v44 = vld [vmem:[%s4887_s13 + $0x50] sm:$0xff] }
 0x809   :  { %v4160_v48 = vpack.c.bf16 %v3436_v1, %v3435_v47  ;;  %v3440_v52 = vld [vmem:[%s4887_s13 + $0x38] sm:$0xff] }
 0x80a   :  { %v3215_v58 = vadd.f32 %v3953_v57, %v3174_v16  ;;  %v4166_v53 = vpack.c.bf16 %v3440_v52, %v3439_v19  ;;  %v3444_v56 = vld [vmem:[%s4887_s13 + $0x58] sm:$0xff]  ;;  %v3446_v16 = vld [vmem:[%s4887_s13 + $0x68] sm:$0xff] }
 0x80b   :  { %4161 = vmatpush3.bf16.msra.mxu1 %v4160_v48  ;;  %v4172_v57 = vpack.c.bf16 %v3444_v56, %v3443_v44 }
 0x80c   :  { %4162 = vmatprep.subr.bf16.mxu1 %v4482_v37 }
 0x80f   :  { %4164 = vmatpush3.bf16.msra.mxu1 %v4163_v51 }
 0x810   :  { %4165 = vmatprep.subr.bf16.mxu1 %v4482_v37 }
 0x813   :  { %4167 = vmatpush3.bf16.msra.mxu1 %v4166_v53 }
 0x814   :  { %4168 = vmatprep.subr.bf16.mxu1 %v4482_v37 }
 0x817   :  { %4170 = vmatpush3.bf16.msra.mxu1 %v4169_v55 }
 0x818   :  { %4171 = vmatprep.subr.bf16.mxu1 %v4482_v37 }
 0x81b   :  { %4173 = vmatpush3.bf16.msra.mxu1 %v4172_v57 }
 0x81c   :  { %4174 = vmatprep.subr.bf16.mxu1 %v4482_v37 }
 0x822   :  { %v3970_v59 = vpop.f32.mrb[36].mxu1  ;;  %v3992_v60 = vpop.f32.mrb[40].mxu0 }
 0x823   :  { %v3971_v17 = vpop.f32.mrb[37].mxu1  ;;  %v3993_v20 = vpop.f32.mrb[41].mxu0 }
 0x824   :  { %v3972_v61 = vadd.f32 %v3971_v17, %v3970_v59  ;;  %v3994_v62 = vadd.f32 %v3993_v20, %v3992_v60  ;;  %v3973_v18 = vpop.f32.mrb[38].mxu1  ;;  %v3995_v63 = vpop.f32.mrb[42].mxu0  ;;  %v3448_v60 = vld [vmem:[%s4887_s13 + $0x78] sm:$0xff] }
 0x825   :  { %v3974_v30 = vpop.f32.mrb[39].mxu1  ;;  %v3996_v5 = vpop.f32.mrb[43].mxu0 }
 0x826   :  { %v3253_v21 = vadd.f32 %v3972_v61, %v3212_v31  ;;  %v3975_v40 = vadd.f32 %v3974_v30, %v3973_v18  ;;  %v3997_v23 = vadd.f32 %v3996_v5, %v3995_v63  ;;  %v3445_v31 = vld [vmem:[%s4887_s13 + $0x60] sm:$0xff] }
 0x827   :  { %v4175_v59 = vpack.c.bf16 %v3446_v16, %v3445_v31 }
 0x828   :  { %v3294_v24 = vadd.f32 %v3994_v62, %v3253_v21  ;;  %v3256_v2 = vadd.f32 %v3975_v40, %v3215_v58  ;;  %v3447_v58 = vld [vmem:[%s4887_s13 + $0x70] sm:$0xff]  ;;  %v3837_v21 = vld [vmem:[%s4885_s11] ss:$0 sm:$0xff]  ;;  %s3533_s11 = sshll.u32 %s4483_s7, 4  ;;  %s3534_s11 = int_to_ptr.vmem [resolvable:$true] %s3533_s11 }
 0x829   :  { %4176 = vmatpush3.bf16.msra.mxu1 %v4175_v59  ;;  %v4178_v17 = vpack.c.bf16 %v3448_v60, %v3447_v58  ;;  %s4443_s9 = scalar_lea.vmem %s3534_s11, 128  ;;  %p4448_p11 = scmp.lt.s32.totalorder %s3534_s11, %s3534_s11 }
 0x82a   :  { %v3297_v3 = vadd.f32 %v3997_v23, %v3256_v2  ;;  %4177 = vmatprep.subr.bf16.mxu1 %v4482_v37  ;;  %p4444_p10 = scmp.ne.s32.totalorder %s3534_s11, %s4443_s9  ;;  %p4449_p12 = scmp.lt.s32.totalorder %s4443_s9, %s4443_s9 }
 0x82c   :  { %p4450_p13 = por %p4449_p12, %p4448_p11 }
 0x82d   :  { %4179 = vmatpush3.bf16.msra.mxu1 %v4178_v17 }
 0x82e   :  { %p4451_p0 = pnand %p4450_p13, %p4444_p10 }
 0x842   :  { %v4014_v4 = vpop.f32.mrb[40].mxu1  ;;  %v4036_v6 = vpop.f32.mrb[44].mxu0 }
 0x843   :  { %v4015_v8 = vpop.f32.mrb[41].mxu1  ;;  %v4037_v9 = vpop.f32.mrb[45].mxu0 }
 0x844   :  { %v4016_v10 = vadd.f32 %v4015_v8, %v4014_v4  ;;  %v4038_v11 = vadd.f32 %v4037_v9, %v4036_v6  ;;  %v4017_v12 = vpop.f32.mrb[42].mxu1  ;;  %v4039_v13 = vpop.f32.mrb[46].mxu0 }
 0x845   :  { %v4018_v14 = vpop.f32.mrb[43].mxu1  ;;  %v4040_v15 = vpop.f32.mrb[47].mxu0 }
 0x846   :  { %v3335_v0 = vadd.f32 %v4016_v10, %v3294_v24  ;;  %v4019_v22 = vadd.f32 %v4018_v14, %v4017_v12  ;;  %v4041_v25 = vadd.f32 %v4040_v15, %v4039_v13 }
 0x848   :  { %v3376_v26 = vadd.f32 %v4038_v11, %v3335_v0  ;;  %v3338_v27 = vadd.f32 %v4019_v22, %v3297_v3  ;;  %v3838_v3 = vld [vmem:[%s4886_s12] ss:$0 sm:$0xff] }
 0x849   :  { %v3839_v11 = vld [vmem:[%s4888_s14] ss:$0 sm:$0xff] }
 0x84a   :  { %v3379_v28 = vadd.f32 %v4041_v25, %v3338_v27  ;;  %v3382_v29 = vadd.f32 %v3376_v26, %v4718_v32 }
 0x84c   :  { %3384 = vadd.xlane.f32.xlu0 %v3382_v29  ;;  %v3383_v35 = vadd.f32 %v3379_v28, %v4720_v34 }
 0x84e   :  { %3386 = vadd.xlane.f32.xlu1 %v3383_v35 }
 0x8d9   :  { %v3385_v39 = vpop.xlane.xlu0 %3384 }
 0x8da   :  { %v3388_v41 = vmul.f32 0.0078125, %v3385_v39 }
 0x8db   :  { %v3387_v32 = vpop.xlane.xlu1 %3386 }
 0x8dc   :  { %v3390_v42 = vsub.f32 %v3382_v29, %v3388_v41  ;;  %v3389_v43 = vmul.f32 0.0078125, %v3387_v32 }
 0x8de   :  { %v3391_v34 = vsub.f32 %v3383_v35, %v3389_v43  ;;  %v3392_v45 = vmul.f32 %v3390_v42, %v3390_v42 }
 0x8e0   :  { %3394 = vadd.xlane.f32.xlu0 %v3392_v45  ;;  %v3393_v46 = vmul.f32 %v3391_v34, %v3391_v34 }
 0x8e2   :  { %3396 = vadd.xlane.f32.xlu1 %v3393_v46 }
 0x96d   :  { %v3395_v20 = vpop.xlane.xlu0 %3394 }
 0x96e   :  { %v3398_v61 = vmul.f32 0.0078125, %v3395_v20 }
 0x96f   :  { %v3397_v62 = vpop.xlane.xlu1 %3396 }
 0x970   :  { %v3400_v18 = vadd.f32 1e-05, %v3398_v61  ;;  %v3399_v63 = vmul.f32 0.0078125, %v3397_v62 }
 0x972   :  { %4373 = vrsqrt.f32 %v3400_v18  ;;  %v3401_v30 = vadd.f32 1e-05, %v3399_v63 }
 0x974   :  { %4375 = vrsqrt.f32 %v3401_v30 }
 0x97c   :  { %v4374_v5 = vpop.eup %4373 }
 0x97d   :  { %v3404_v40 = vmul.f32 %v4374_v5, %v3390_v42 }
 0x97e   :  { %v4376_v23 = vpop.eup %4375 }
 0x97f   :  { %v3405_v24 = vmul.f32 %v4376_v23, %v3391_v34  ;;  %v3413_v2 = vmul.f32 %v3837_v21, %v3404_v40 }
 0x981   :  { %v3414_v4 = vmul.f32 %v3837_v21, %v3405_v24  ;;  %v3422_v6 = vadd.f32 %v3838_v3, %v3413_v2 }
 0x983   :  { %v3423_v8 = vadd.f32 %v3838_v3, %v3414_v4 }
 0x985   :  { %v3425_v9 = vadd.f32 %v3423_v8, %v3422_v6 }
 0x987   :  { %v3432_v10 = vmul.f32 0.5, %v3425_v9 }
 0x989   :  { %4154 = vmatmul.mubr.f32.vlgmr.msra.gmra.mrb[6].mxu1 %v3432_v10 }
 0xa5c   :  { %v3522_v12 = vpop.f32.mrb[6].mxu1 }
 0xa5d   :  { %v3523_v13 = vadd.f32 %v3839_v11, %v3522_v12  ;;  %v4155_v14 = vpop.f32.mrb[7].mxu1 }
 0xa5f   :  { %3526 = vst.msk [vmem:[#allocation9] sm:$0xff] %vm502_vm2, %v3523_v13 }
 0xa60   :  { %4454 = shalt.err (!%p4451_p0)
}
 0xa61   :  { %s4455_s19 = scalar_lea.hbm %s4889_s15, 128 }
 0xa62   :  { %p4456_p1 = scmp.ne.s32.totalorder %s4889_s15, %s4455_s19  ;;  %p4459_p2 = scmp.lt.u32.totalorder %s4455_s19, %s4889_s15 }
 0xa64   :  { %p4461_p3 = pnand %p4459_p2, %p4456_p1 }
 0xa66   :  { %4464 = shalt.err (!%p4461_p3)
}
 0xa67   :  { %3536 = dma.vmem_to_hbm [thread:$0]  %s3534_s11, 128, %s4889_s15, [#allocation5]  }
 0xa68   :  { %4469 = dma.done.wait [#allocation5], 128  }
 0xa69   :  { %4470 = vsyncadd [#allocation5], 4294967168 }
 0xa6a   :  { %3540 = vsyncpa [#allocation4], 1 }
 0xa6b   :  { %3541 = vsyncpa [#allocation7], 1 }
 0xa6c   :  { %3542 = vsyncpa [#allocation5], 1 }

</bundles_post_ra>
